<compile_context>
chip_gen: v5e
topology: v5e:2x2
jax: 0.10.0
libtpu: 0.0.40
codegen_flags: <defaults>
</compile_context>

<pallas_src>
import functools

import jax
import jax.numpy as jnp
from jax.experimental import pallas as pl
from jax.experimental.pallas import tpu as pltpu


# ----------------------------- Pallas kernel --------------------------------

def _critic_kernel(h_ref, z_ref, w0h_ref, w0z_ref, wb_ref, g_ref, b_ref,
                   wout_ref, logits_ref, *, n_blocks, ln_eps):
    """One batch tile of the Critic MLP (bf16 MXU matmuls, f32 elementwise)."""
    # Split input projection: [h, z] @ W0 == h @ W0[:H] + z @ W0[H:].
    acc = jnp.dot(h_ref[...], w0h_ref[...], preferred_element_type=jnp.float32)
    acc = acc + jnp.dot(z_ref[...], w0z_ref[...],
                        preferred_element_type=jnp.float32)
    hcur = acc                                                      # (TB, M) f32

    # MLP blocks: Linear -> LayerNorm -> SiLU (static Python loop, n_blocks small).
    for l in range(n_blocks):
        y = jnp.dot(hcur.astype(jnp.bfloat16), wb_ref[l],
                    preferred_element_type=jnp.float32)             # (TB, M) f32
        mu = jnp.mean(y, axis=-1, keepdims=True)
        var = jnp.mean(jnp.square(y - mu), axis=-1, keepdims=True)
        yn = (y - mu) * jax.lax.rsqrt(var + ln_eps)
        yn = yn * g_ref[l] + b_ref[l]                               # affine LayerNorm (f32)
        hcur = yn * jax.nn.sigmoid(yn)                              # SiLU (f32)

    # Output head (zero-initialized, bias-free) -> 256 bucket logits (lane-dense).
    logits_ref[...] = jnp.dot(hcur.astype(jnp.bfloat16), wout_ref[...],
                              preferred_element_type=jnp.float32)


# ------------------------------ Python wrapper -------------------------------

def critic_forward(h, z, params, *, batch_tile=128, ln_eps=1e-5):
    """Critic forward pass. Returns (logits (B, 256), dist_mean (B,))."""
    B = h.shape[0]
    z_flat = z.reshape(B, -1)                                       # torch .flatten(-2)
    w0, w_blocks, gammas, betas, w_out, bins = params

    H = h.shape[1]
    ZC = z_flat.shape[1]
    mlp = w0.shape[1]
    n_blocks = w_blocks.shape[0]
    n_buckets = w_out.shape[1]

    # bf16 operands into the MXU; accumulation stays f32 inside the kernel.
    h_bf = h.astype(jnp.bfloat16)
    z_bf = z_flat.astype(jnp.bfloat16)
    w0h = w0[:H].astype(jnp.bfloat16)
    w0z = w0[H:].astype(jnp.bfloat16)
    wb = w_blocks.astype(jnp.bfloat16)
    wout = w_out.astype(jnp.bfloat16)
    g = gammas.astype(jnp.float32)
    b = betas.astype(jnp.float32)

    # Large batch tiles fill the MXU sublane dimension; keep >= 2 grid steps when
    # B allows so the parallel axis can shard across v7x's two TensorCores.
    batch_tile = min(batch_tile, B)
    assert B % batch_tile == 0, "B must be a multiple of batch_tile"
    grid = (B // batch_tile,)

    kernel = functools.partial(_critic_kernel, n_blocks=n_blocks, ln_eps=ln_eps)

    logits = pl.pallas_call(
        kernel,
        out_shape=jax.ShapeDtypeStruct((B, n_buckets), jnp.float32),
        grid_spec=pltpu.PrefetchScalarGridSpec(
            num_scalar_prefetch=0,
            grid=grid,
            in_specs=[
                pl.BlockSpec((batch_tile, H), lambda i: (i, 0)),          # h tile
                pl.BlockSpec((batch_tile, ZC), lambda i: (i, 0)),         # z_flat tile
                pl.BlockSpec((H, mlp), lambda i: (0, 0)),                 # W0[:H]
                pl.BlockSpec((ZC, mlp), lambda i: (0, 0)),                # W0[H:]
                pl.BlockSpec((n_blocks, mlp, mlp), lambda i: (0, 0, 0)),  # block weights
                pl.BlockSpec((n_blocks, 1, mlp), lambda i: (0, 0, 0)),    # LN gamma
                pl.BlockSpec((n_blocks, 1, mlp), lambda i: (0, 0, 0)),    # LN beta
                pl.BlockSpec((mlp, n_buckets), lambda i: (0, 0)),         # W_out
            ],
            out_specs=pl.BlockSpec((batch_tile, n_buckets), lambda i: (i, 0)),
        ),
        compiler_params=pltpu.CompilerParams(
            dimension_semantics=("parallel",),
            vmem_limit_bytes=48 * 1024 * 1024,   # explicit budget (fits v7x 64 MiB)
        ),
    )(h_bf, z_bf, w0h, w0z, wb, g, b, wout)

    # TwoHotSymlog distribution mean computed from the lane-dense logits in the
    # wrapper (avoids a last-dim-1 masked-store output from the kernel).
    probs = jax.nn.softmax(logits, axis=-1)
    expected = probs @ bins.astype(jnp.float32)                     # (B,)
    dist_mean = jnp.sign(expected) * jnp.expm1(jnp.abs(expected))   # symexp
    return logits, dist_mean


# ------------------------------ Pure-JAX reference ---------------------------

def _critic_reference(h, z, params, *, ln_eps=1e-5):
    """Reference with the same bf16-matmul / f32-accumulate scheme as the kernel."""
    w0, w_blocks, gammas, betas, w_out, bins = params
    x = jnp.concatenate([h, z.reshape(z.shape[0], -1)], axis=-1).astype(jnp.bfloat16)
    hcur = jnp.dot(x, w0.astype(jnp.bfloat16), preferred_element_type=jnp.float32)
    for l in range(w_blocks.shape[0]):
        y = jnp.dot(hcur.astype(jnp.bfloat16), w_blocks[l].astype(jnp.bfloat16),
                    preferred_element_type=jnp.float32)
        mu = jnp.mean(y, axis=-1, keepdims=True)
        var = jnp.mean(jnp.square(y - mu), axis=-1, keepdims=True)
        yn = (y - mu) * jax.lax.rsqrt(var + ln_eps)
        yn = yn * gammas[l] + betas[l]
        hcur = yn * jax.nn.sigmoid(yn)
    logits = jnp.dot(hcur.astype(jnp.bfloat16), w_out.astype(jnp.bfloat16),
                     preferred_element_type=jnp.float32)
    probs = jax.nn.softmax(logits, axis=-1)
    expected = probs @ bins.astype(jnp.float32)
    return logits, jnp.sign(expected) * jnp.expm1(jnp.abs(expected))


# ----------------------------- Parameter setup -------------------------------

def init_params(key, h_size, z_size, z_classes, mlp_size, mlp_layers, n_buckets=256):
    """Deterministic synthetic parameters matching the torch module's shapes."""
    d_in = h_size + z_size * z_classes
    k0, k1 = jax.random.split(key, 2)

    def kaiming_uniform(k, fan_in, shape):
        bound = 1.0 / jnp.sqrt(fan_in)
        return jax.random.uniform(k, shape, jnp.float32, -bound, bound)

    # Linear weights stored as (in, out) == torch weight.T
    w0 = kaiming_uniform(k0, d_in, (d_in, mlp_size))
    blk_keys = jax.random.split(k1, mlp_layers)
    w_blocks = jnp.stack(
        [kaiming_uniform(bk, mlp_size, (mlp_size, mlp_size)) for bk in blk_keys])
    gammas = jnp.ones((mlp_layers, 1, mlp_size), jnp.float32)    # LayerNorm init
    betas = jnp.zeros((mlp_layers, 1, mlp_size), jnp.float32)
    w_out = jnp.zeros((mlp_size, n_buckets), jnp.float32)        # out_layer.weight.data.zero_()
    bins = jnp.linspace(-20.0, 20.0, n_buckets, dtype=jnp.float32)
    return (w0, w_blocks, gammas, betas, w_out, bins)


# ---------------------------------- main -------------------------------------

if __name__ == "__main__":
    # Small, TPU-friendly shapes consistent with the module's forward.
    B = 256               # 2 grid steps at batch_tile=128 (both v7x cores busy)
    H_SIZE = 128
    Z_SIZE = 8
    Z_CLASSES = 16        # z_flat = 128 -> concat dim = 256
    MLP_SIZE = 128
    MLP_LAYERS = 2

    key = jax.random.PRNGKey(0)
    kh, kz, kp, kw = jax.random.split(key, 4)
    h = jax.random.normal(kh, (B, H_SIZE), jnp.float32)
    z = jax.random.normal(kz, (B, Z_SIZE, Z_CLASSES), jnp.float32)

    params = init_params(kp, H_SIZE, Z_SIZE, Z_CLASSES, MLP_SIZE, MLP_LAYERS)

    # Faithful module (zero output head).
    logits, dist_mean = critic_forward(h, z, params)
    jax.block_until_ready((logits, dist_mean))
    assert logits.shape == (B, 256)
    assert dist_mean.shape == (B,)

    # Numerical check against a pure-JAX reference (also exercise a non-zero head).
    w0, w_blocks, gammas, betas, w_out, bins = params
    w_out_rnd = 0.05 * jax.random.normal(kw, w_out.shape, jnp.float32)
    params_rnd = (w0, w_blocks, gammas, betas, w_out_rnd, bins)

    lg_k, mn_k = critic_forward(h, z, params_rnd)
    lg_r, mn_r = _critic_reference(h, z, params_rnd)
    jax.block_until_ready((lg_k, mn_k, lg_r, mn_r))
    assert jnp.allclose(lg_k, lg_r, atol=1e-2, rtol=1e-2), "logits mismatch"
    assert jnp.allclose(mn_k, mn_r, atol=1e-2, rtol=1e-2), "dist mean mismatch"

    print("KERNEL_OK")
</pallas_src>

<mosaic_0001>
module attributes {stable_mosaic.version = 11 : i64} {
  func.func @_critic_kernel(%arg0: i32, %arg1: memref<128x128xbf16, #tpu.memory_space<vmem>>, %arg2: memref<128x128xbf16, #tpu.memory_space<vmem>>, %arg3: memref<128x128xbf16, #tpu.memory_space<vmem>>, %arg4: memref<128x128xbf16, #tpu.memory_space<vmem>>, %arg5: memref<2x128x128xbf16, #tpu.memory_space<vmem>>, %arg6: memref<2x1x128xf32, #tpu.memory_space<vmem>>, %arg7: memref<2x1x128xf32, #tpu.memory_space<vmem>>, %arg8: memref<128x256xbf16, #tpu.memory_space<vmem>>, %arg9: memref<128x256xf32, #tpu.memory_space<vmem>>) attributes {dimension_semantics = [#tpu.dimension_semantics<parallel>], iteration_bounds = array<i64: 2>, scalar_prefetch = 0 : i64, scratch_operands = 0 : i64, tpu.core_type = #tpu.core_type<tc>, window_params = [{transform_indices = @transform_0, window_bounds = array<i64: 128, 128>}, {transform_indices = @transform_1, window_bounds = array<i64: 128, 128>}, {pipeline_mode = #tpu.pipeline_mode<synchronous>, transform_indices = @transform_2, window_bounds = array<i64: 128, 128>}, {pipeline_mode = #tpu.pipeline_mode<synchronous>, transform_indices = @transform_3, window_bounds = array<i64: 128, 128>}, {pipeline_mode = #tpu.pipeline_mode<synchronous>, transform_indices = @transform_4, window_bounds = array<i64: 2, 128, 128>}, {pipeline_mode = #tpu.pipeline_mode<synchronous>, transform_indices = @transform_5, window_bounds = array<i64: 2, 1, 128>}, {pipeline_mode = #tpu.pipeline_mode<synchronous>, transform_indices = @transform_6, window_bounds = array<i64: 2, 1, 128>}, {pipeline_mode = #tpu.pipeline_mode<synchronous>, transform_indices = @transform_7, window_bounds = array<i64: 128, 256>}, {transform_indices = @transform_8, window_bounds = array<i64: 128, 256>}]} {
    %c0 = arith.constant 0 : index
    %c0_0 = arith.constant 0 : index
    %0 = vector.load %arg1[%c0, %c0_0] : memref<128x128xbf16, #tpu.memory_space<vmem>>, vector<128x128xbf16>
    %c0_1 = arith.constant 0 : index
    %c0_2 = arith.constant 0 : index
    %1 = vector.load %arg3[%c0_1, %c0_2] : memref<128x128xbf16, #tpu.memory_space<vmem>>, vector<128x128xbf16>
    %cst = arith.constant dense<0.000000e+00> : vector<128x128xf32>
    %2 = tpu.matmul %0, %1, %cst {dimension_numbers = #tpu.dot_dimension_numbers<[1], [0], [0], [1], [0, 0, 1, 1], [], []>} : vector<128x128xbf16>, vector<128x128xbf16>, vector<128x128xf32> -> vector<128x128xf32>
    %c0_3 = arith.constant 0 : index
    %c0_4 = arith.constant 0 : index
    %3 = vector.load %arg2[%c0_3, %c0_4] : memref<128x128xbf16, #tpu.memory_space<vmem>>, vector<128x128xbf16>
    %c0_5 = arith.constant 0 : index
    %c0_6 = arith.constant 0 : index
    %4 = vector.load %arg4[%c0_5, %c0_6] : memref<128x128xbf16, #tpu.memory_space<vmem>>, vector<128x128xbf16>
    %cst_7 = arith.constant dense<0.000000e+00> : vector<128x128xf32>
    %5 = tpu.matmul %3, %4, %cst_7 {dimension_numbers = #tpu.dot_dimension_numbers<[1], [0], [0], [1], [0, 0, 1, 1], [], []>} : vector<128x128xbf16>, vector<128x128xbf16>, vector<128x128xf32> -> vector<128x128xf32>
    %6 = arith.addf %2, %5 : vector<128x128xf32>
    %7 = arith.truncf %6 : vector<128x128xf32> to vector<128x128xbf16>
    %c0_8 = arith.constant 0 : index
    %c0_9 = arith.constant 0 : index
    %c0_10 = arith.constant 0 : index
    %8 = vector.load %arg5[%c0_8, %c0_9, %c0_10] : memref<2x128x128xbf16, #tpu.memory_space<vmem>>, vector<1x128x128xbf16>
    %9 = vector.shape_cast %8 : vector<1x128x128xbf16> to vector<128x128xbf16>
    %cst_11 = arith.constant dense<0.000000e+00> : vector<128x128xf32>
    %10 = tpu.matmul %7, %9, %cst_11 {dimension_numbers = #tpu.dot_dimension_numbers<[1], [0], [0], [1], [0, 0, 1, 1], [], []>} : vector<128x128xbf16>, vector<128x128xbf16>, vector<128x128xf32> -> vector<128x128xf32>
    %cst_12 = arith.constant dense<0.000000e+00> : vector<128xf32>
    %11 = vector.multi_reduction <add>, %10, %cst_12 [1] : vector<128x128xf32> to vector<128xf32>
    %12 = vector.shape_cast %11 : vector<128xf32> to vector<128x1xf32>
    %cst_13 = arith.constant 1.280000e+02 : f32
    %13 = vector.broadcast %cst_13 : f32 to vector<128x1xf32>
    %14 = arith.divf %12, %13 : vector<128x1xf32>
    %15 = vector.broadcast %14 : vector<128x1xf32> to vector<128x128xf32>
    %16 = arith.subf %10, %15 : vector<128x128xf32>
    %17 = arith.mulf %16, %16 : vector<128x128xf32>
    %cst_14 = arith.constant dense<0.000000e+00> : vector<128xf32>
    %18 = vector.multi_reduction <add>, %17, %cst_14 [1] : vector<128x128xf32> to vector<128xf32>
    %19 = vector.shape_cast %18 : vector<128xf32> to vector<128x1xf32>
    %cst_15 = arith.constant 1.280000e+02 : f32
    %20 = vector.broadcast %cst_15 : f32 to vector<128x1xf32>
    %21 = arith.divf %19, %20 : vector<128x1xf32>
    %22 = vector.broadcast %14 : vector<128x1xf32> to vector<128x128xf32>
    %23 = arith.subf %10, %22 : vector<128x128xf32>
    %cst_16 = arith.constant 9.99999974E-6 : f32
    %24 = vector.broadcast %cst_16 : f32 to vector<128x1xf32>
    %25 = arith.addf %21, %24 : vector<128x1xf32>
    %26 = math.rsqrt %25 : vector<128x1xf32>
    %27 = vector.broadcast %26 : vector<128x1xf32> to vector<128x128xf32>
    %28 = arith.mulf %23, %27 : vector<128x128xf32>
    %c0_17 = arith.constant 0 : index
    %c0_18 = arith.constant 0 : index
    %c0_19 = arith.constant 0 : index
    %29 = vector.load %arg6[%c0_17, %c0_18, %c0_19] : memref<2x1x128xf32, #tpu.memory_space<vmem>>, vector<1x1x128xf32>
    %30 = vector.shape_cast %29 : vector<1x1x128xf32> to vector<1x128xf32>
    %31 = vector.broadcast %30 : vector<1x128xf32> to vector<128x128xf32>
    %32 = arith.mulf %28, %31 : vector<128x128xf32>
    %c0_20 = arith.constant 0 : index
    %c0_21 = arith.constant 0 : index
    %c0_22 = arith.constant 0 : index
    %33 = vector.load %arg7[%c0_20, %c0_21, %c0_22] : memref<2x1x128xf32, #tpu.memory_space<vmem>>, vector<1x1x128xf32>
    %34 = vector.shape_cast %33 : vector<1x1x128xf32> to vector<1x128xf32>
    %35 = vector.broadcast %34 : vector<1x128xf32> to vector<128x128xf32>
    %36 = arith.addf %32, %35 : vector<128x128xf32>
    %37 = arith.negf %36 : vector<128x128xf32>
    %38 = math.exp %37 : vector<128x128xf32>
    %cst_23 = arith.constant 1.000000e+00 : f32
    %39 = vector.broadcast %cst_23 : f32 to vector<128x128xf32>
    %40 = arith.addf %39, %38 : vector<128x128xf32>
    %41 = arith.divf %39, %40 : vector<128x128xf32>
    %42 = arith.mulf %36, %41 : vector<128x128xf32>
    %43 = arith.truncf %42 : vector<128x128xf32> to vector<128x128xbf16>
    %c1 = arith.constant 1 : index
    %c0_24 = arith.constant 0 : index
    %c0_25 = arith.constant 0 : index
    %44 = vector.load %arg5[%c1, %c0_24, %c0_25] : memref<2x128x128xbf16, #tpu.memory_space<vmem>>, vector<1x128x128xbf16>
    %45 = vector.shape_cast %44 : vector<1x128x128xbf16> to vector<128x128xbf16>
    %cst_26 = arith.constant dense<0.000000e+00> : vector<128x128xf32>
    %46 = tpu.matmul %43, %45, %cst_26 {dimension_numbers = #tpu.dot_dimension_numbers<[1], [0], [0], [1], [0, 0, 1, 1], [], []>} : vector<128x128xbf16>, vector<128x128xbf16>, vector<128x128xf32> -> vector<128x128xf32>
    %cst_27 = arith.constant dense<0.000000e+00> : vector<128xf32>
    %47 = vector.multi_reduction <add>, %46, %cst_27 [1] : vector<128x128xf32> to vector<128xf32>
    %48 = vector.shape_cast %47 : vector<128xf32> to vector<128x1xf32>
    %cst_28 = arith.constant 1.280000e+02 : f32
    %49 = vector.broadcast %cst_28 : f32 to vector<128x1xf32>
    %50 = arith.divf %48, %49 : vector<128x1xf32>
    %51 = vector.broadcast %50 : vector<128x1xf32> to vector<128x128xf32>
    %52 = arith.subf %46, %51 : vector<128x128xf32>
    %53 = arith.mulf %52, %52 : vector<128x128xf32>
    %cst_29 = arith.constant dense<0.000000e+00> : vector<128xf32>
    %54 = vector.multi_reduction <add>, %53, %cst_29 [1] : vector<128x128xf32> to vector<128xf32>
    %55 = vector.shape_cast %54 : vector<128xf32> to vector<128x1xf32>
    %cst_30 = arith.constant 1.280000e+02 : f32
    %56 = vector.broadcast %cst_30 : f32 to vector<128x1xf32>
    %57 = arith.divf %55, %56 : vector<128x1xf32>
    %58 = vector.broadcast %50 : vector<128x1xf32> to vector<128x128xf32>
    %59 = arith.subf %46, %58 : vector<128x128xf32>
    %cst_31 = arith.constant 9.99999974E-6 : f32
    %60 = vector.broadcast %cst_31 : f32 to vector<128x1xf32>
    %61 = arith.addf %57, %60 : vector<128x1xf32>
    %62 = math.rsqrt %61 : vector<128x1xf32>
    %63 = vector.broadcast %62 : vector<128x1xf32> to vector<128x128xf32>
    %64 = arith.mulf %59, %63 : vector<128x128xf32>
    %c1_32 = arith.constant 1 : index
    %c0_33 = arith.constant 0 : index
    %c0_34 = arith.constant 0 : index
    %65 = vector.load %arg6[%c1_32, %c0_33, %c0_34] : memref<2x1x128xf32, #tpu.memory_space<vmem>>, vector<1x1x128xf32>
    %66 = vector.shape_cast %65 : vector<1x1x128xf32> to vector<1x128xf32>
    %67 = vector.broadcast %66 : vector<1x128xf32> to vector<128x128xf32>
    %68 = arith.mulf %64, %67 : vector<128x128xf32>
    %c1_35 = arith.constant 1 : index
    %c0_36 = arith.constant 0 : index
    %c0_37 = arith.constant 0 : index
    %69 = vector.load %arg7[%c1_35, %c0_36, %c0_37] : memref<2x1x128xf32, #tpu.memory_space<vmem>>, vector<1x1x128xf32>
    %70 = vector.shape_cast %69 : vector<1x1x128xf32> to vector<1x128xf32>
    %71 = vector.broadcast %70 : vector<1x128xf32> to vector<128x128xf32>
    %72 = arith.addf %68, %71 : vector<128x128xf32>
    %73 = arith.negf %72 : vector<128x128xf32>
    %74 = math.exp %73 : vector<128x128xf32>
    %cst_38 = arith.constant 1.000000e+00 : f32
    %75 = vector.broadcast %cst_38 : f32 to vector<128x128xf32>
    %76 = arith.addf %75, %74 : vector<128x128xf32>
    %77 = arith.divf %75, %76 : vector<128x128xf32>
    %78 = arith.mulf %72, %77 : vector<128x128xf32>
    %79 = arith.truncf %78 : vector<128x128xf32> to vector<128x128xbf16>
    %c0_39 = arith.constant 0 : index
    %c0_40 = arith.constant 0 : index
    %80 = vector.load %arg8[%c0_39, %c0_40] : memref<128x256xbf16, #tpu.memory_space<vmem>>, vector<128x256xbf16>
    %cst_41 = arith.constant dense<0.000000e+00> : vector<128x256xf32>
    %81 = tpu.matmul %79, %80, %cst_41 {dimension_numbers = #tpu.dot_dimension_numbers<[1], [0], [0], [1], [0, 0, 1, 1], [], []>} : vector<128x128xbf16>, vector<128x256xbf16>, vector<128x256xf32> -> vector<128x256xf32>
    %c0_42 = arith.constant 0 : index
    %c0_43 = arith.constant 0 : index
    %82 = vector.load %arg9[%c0_42, %c0_43] : memref<128x256xf32, #tpu.memory_space<vmem>>, vector<128x256xf32>
    tpu.vector_store %arg9[%c0_42, %c0_43], %81 {strides = array<i32>} : memref<128x256xf32, #tpu.memory_space<vmem>>, vector<128x256xf32>,
    return
  }
  func.func @transform_0(%arg0: i32) -> (i32, i32) {
    %c0_i32 = arith.constant 0 : i32
    %c0_i32_0 = arith.constant 0 : i32
    return %arg0, %c0_i32 : i32, i32
  }
  func.func @transform_1(%arg0: i32) -> (i32, i32) {
    %c0_i32 = arith.constant 0 : i32
    %c0_i32_0 = arith.constant 0 : i32
    return %arg0, %c0_i32 : i32, i32
  }
  func.func @transform_2(%arg0: i32) -> (i32, i32) {
    %c0_i32 = arith.constant 0 : i32
    %c0_i32_0 = arith.constant 0 : i32
    %c0_i32_1 = arith.constant 0 : i32
    return %c0_i32, %c0_i32_0 : i32, i32
  }
  func.func @transform_3(%arg0: i32) -> (i32, i32) {
    %c0_i32 = arith.constant 0 : i32
    %c0_i32_0 = arith.constant 0 : i32
    %c0_i32_1 = arith.constant 0 : i32
    return %c0_i32, %c0_i32_0 : i32, i32
  }
  func.func @transform_4(%arg0: i32) -> (i32, i32, i32) {
    %c0_i32 = arith.constant 0 : i32
    %c0_i32_0 = arith.constant 0 : i32
    %c0_i32_1 = arith.constant 0 : i32
    %c0_i32_2 = arith.constant 0 : i32
    return %c0_i32, %c0_i32_0, %c0_i32_1 : i32, i32, i32
  }
  func.func @transform_5(%arg0: i32) -> (i32, i32, i32) {
    %c0_i32 = arith.constant 0 : i32
    %c0_i32_0 = arith.constant 0 : i32
    %c0_i32_1 = arith.constant 0 : i32
    %c0_i32_2 = arith.constant 0 : i32
    return %c0_i32, %c0_i32_0, %c0_i32_1 : i32, i32, i32
  }
  func.func @transform_6(%arg0: i32) -> (i32, i32, i32) {
    %c0_i32 = arith.constant 0 : i32
    %c0_i32_0 = arith.constant 0 : i32
    %c0_i32_1 = arith.constant 0 : i32
    %c0_i32_2 = arith.constant 0 : i32
    return %c0_i32, %c0_i32_0, %c0_i32_1 : i32, i32, i32
  }
  func.func @transform_7(%arg0: i32) -> (i32, i32) {
    %c0_i32 = arith.constant 0 : i32
    %c0_i32_0 = arith.constant 0 : i32
    %c0_i32_1 = arith.constant 0 : i32
    return %c0_i32, %c0_i32_0 : i32, i32
  }
  func.func @transform_8(%arg0: i32) -> (i32, i32) {
    %c0_i32 = arith.constant 0 : i32
    %c0_i32_0 = arith.constant 0 : i32
    return %arg0, %c0_i32 : i32, i32
  }
}

</mosaic_0001>

<bundles_post_ra>
// kernel: tpu_custom_call.1
= control target key start
LH: loop header
LB: loop body
LE: loop exit
PB: predicated region body
PF: predicated region fallthrough
CT: control target
= control target key end

     0   :  { %s4864_s0 = inlined_call_operand.hbm [shape: bf16[256,128], index: 0, kind: input, shape index: {}]   ;;  %s4865_s1 = inlined_call_operand.hbm [shape: bf16[256,128], index: 1, kind: input, shape index: {}]   ;;  %s4866_s2 = inlined_call_operand.hbm [shape: bf16[128,128], index: 2, kind: input, shape index: {}]   ;;  %s4867_s3 = inlined_call_operand.hbm [shape: bf16[128,128], index: 3, kind: input, shape index: {}]   ;;  %s4868_s4 = inlined_call_operand.hbm [shape: bf16[2,128,128], index: 4, kind: input, shape index: {}]   ;;  %s4869_s5 = inlined_call_operand.vmem [shape: f32[2,1,128], index: 5, kind: input, shape index: {}]   ;;  %s4870_s6 = inlined_call_operand.vmem [shape: f32[2,1,128], index: 6, kind: input, shape index: {}]   ;;  %s4871_s7 = inlined_call_operand.hbm [shape: bf16[128,256], index: 7, kind: input, shape index: {}]   ;;  %s4872_s8 = inlined_call_operand.hbm [shape: f32[256,256], index: 8, kind: output, shape index: {}]  }
   0x1   :  { %4878 = sst [smem:[#allocation22_spill]] %s4864_s0 }
   0x2   :  { %4879 = sst [smem:[#allocation23_spill]] %s4866_s2 }
   0x3   :  { %4880 = sst [smem:[#allocation24_spill]] %s4867_s3 }
   0x4   :  { %4881 = sst [smem:[#allocation25_spill]] %s4868_s4 }
   0x5   :  { %4882 = sst [smem:[#allocation26_spill]] %s4871_s7 }
   0x6   :  { %13 = vsyncpa [#allocation3], 0 }
   0x7   :  { %15 = vsyncpa [#allocation3 + $0x1], 0 }
   0x8   :  { %16 = vsyncpa [#allocation6], 0 }
   0x9   :  { %18 = vsyncpa [#allocation6 + $0x1], 0 }
   0xa   :  { %19 = vsyncpa [#allocation9], 0 }
   0xb   :  { %20 = vsyncpa [#allocation12], 0 }
   0xc   :  { %21 = vsyncpa [#allocation4], 0 }
   0xd   :  { %23 = vsyncpa [#allocation4 + $0x1], 0  ;;  %s3810_s27 = smov 0   ;;  %s3812_s28 = smov 0  }
   0xe   :  { %s3814_s29 = smov 0   ;;  %s3816_s30 = smov 0  }
   0xf LB: > { %4883 = sst [smem:[#allocation20_spill]] %s3748_s29  ;;  %s3831_s9 = sadd.s32 4294967295, %s3752_s30   ;;  %s3752_s30 = sphi %s3816_s30, %s4921_s30   ;;  %s3748_s29 = sphi %s3814_s29, %s4918_s29   ;;  %s3744_s28 = sphi %s3812_s28, %s4920_s28   ;;  %s3740_s27 = sphi %s3810_s27, %s4919_s27  }
  0x10   : > { %s2788_s10 = sadd.s32 4294967294, %s3752_s30   ;;  %p49_p0 = scmp.ne.s32.totalorder %s3744_s28, %s3740_s27 }
  0x11   : > { %p50_p1 = scmp.eq.s32.totalorder %s3831_s9, 0  ;;  %p225_p2 = scmp.eq.s32.totalorder %s3831_s9, 1 }
  0x12   : > { %p231_p3 = scmp.eq.s32.totalorder %s2788_s10, 1  ;;  %p2789_p5 = scmp.ge.s32.totalorder %s3752_s30, 1 }
  0x13   : > { %p3840_p4 = por %p50_p1, %p49_p0  ;;  %p238_p7 = scmp.lt.s32.totalorder %s3752_s30, 3 }
  0x14   : > { %p3845_p6 = por %p231_p3, %p49_p0  ;;  %s4886_s2 = sld [smem:[#allocation23_spill]] }
  0x15   : > { %p3853_p8 = pnand %p2789_p5, %p238_p7  ;;  %s3754_s17 = smov [#allocation7]  }
  0x16   : > { %s251_s18 = sshll.u32 %s3754_s17, 4  ;;  %s4889_s3 = sld [smem:[#allocation24_spill]]  ;;  %s252_s18 = int_to_ptr.vmem [resolvable:$true] %s251_s18 }
  0x17   : > { %p3211_p9 = pneg %p3853_p8  ;;  %s4873_s23 = smov 64  }
  0x18   : > { %s4875_s24 = smov 4   ;;  %s3757_s25 = smov [#allocation8]  }
  0x19   : > { %p3861_p10 = pnand %p3211_p9, %p50_p1  ;;  %s265_s26 = sshll.u32 %s3757_s25, 4  ;;  %s266_s26 = int_to_ptr.vmem [resolvable:$true] %s265_s26 }
  0x1a   : > { %s249_s15 = sshll.u32 %s4886_s2, 4  ;;  %s4890_s4 = sld [smem:[#allocation25_spill]]  ;;  %s250_s15 = int_to_ptr.hbm [resolvable:$true] %s249_s15 }
  0x1b   : > { %3214 = dma.hbm_to_vmem [thread:$0]  (!%p3861_p10), %s250_s15, 1024, %s252_s18, [#allocation6], %s4873_s23, %s4873_s23, %s4875_s24  }
  0x1c   : > { %s263_s22 = sshll.u32 %s4889_s3, 4  ;;  %s4891_s7 = sld [smem:[#allocation26_spill]]  ;;  %s264_s22 = int_to_ptr.hbm [resolvable:$true] %s263_s22 }
  0x1d   : > { %3217 = dma.hbm_to_vmem [thread:$0]  (!%p3861_p10), %s264_s22, 1024, %s266_s26, [#allocation9], %s4873_s23, %s4873_s23, %s4875_s24  }
  0x1e   : > { %s3758_s18 = smov [#allocation10]   ;;  %s3759_s22 = smov [#allocation11]  }
  0x1f   : > { %s279_s21 = sshll.u32 %s3758_s18, 4  ;;  %s299_s25 = sshll.u32 %s3759_s22, 4  ;;  %s280_s21 = int_to_ptr.vmem [resolvable:$true] %s279_s21  ;;  %s300_s25 = int_to_ptr.vmem [resolvable:$true] %s299_s25 }
  0x20   : > { %s277_s14 = sshll.u32 %s4890_s4, 4  ;;  %s3760_s26 = smov 128   ;;  %s278_s14 = int_to_ptr.hbm [resolvable:$true] %s277_s14 }
  0x21   : > { %3220 = dma.hbm_to_vmem [thread:$0]  (!%p3861_p10), %s278_s14, 2048, %s280_s21, [#allocation9], %s4873_s23, %s4873_s23, %s4875_s24  }
  0x22   : > { %s297_s15 = sshll.u32 %s4891_s7, 4  ;;  %s3761_s10 = smov 8   ;;  %s298_s15 = int_to_ptr.hbm [resolvable:$true] %s297_s15 }
  0x23   : > { %3223 = dma.hbm_to_vmem [thread:$0]  (!%p3861_p10), %s298_s15, 2048, %s300_s25, [#allocation12], %s3760_s26, %s3760_s26, %s3761_s10  }
  0x24   : > { %s3893_s13 = sadd.s32 1, %s3752_s30   ;;  %s36_s20 = sadd.s32 1, %s3748_s29 }
  0x25   : > { %s33_s17 = ssub.s32 %s3752_s30, %s3893_s13  ;;  %p43_p13 = scmp.ne.s32.totalorder %s3748_s29, %s3744_s28 }
  0x26   : > { %p34_p12 = scmp.eq.s32.totalorder %s33_s17, 0  ;;  %p44_p0 = scmp.eq.s32.totalorder %s3752_s30, 0 }
  0x27   : > { %p3906_p5 = por %p225_p2, %p43_p13  ;;  %p3239_p7 = scmp.lt.s32.totalorder %s3752_s30, 2 }
  0x28   : > { %s3902_s18 = scalar_select %p34_p12, %s3748_s29, %s36_s20  }
  0x29   : > { %p45_p3 = por %p44_p0, %p43_p13  ;;  %s313_s21 = sand.u32 1, %s3748_s29  }
  0x2a   : > { %4892 = sst [smem:[#allocation21_spill]] %s3902_s18  ;;  %s3912_s19 = sshll.u32 %s313_s21, 6 }
  0x2b   : > { %s3105_s15 = sshll.u32 %s3752_s30, 6  ;;  %s4894_s0 = sld [smem:[#allocation22_spill]] }
  0x2c   : > { %s317_s10 = scalar_lea.vmem [#allocation2], %s3912_s19  ;;  %p3919_p9 = pnand %p3239_p7, %p45_p3 }
  0x2d   : > { %s325_s17 = sshll.u32 %s317_s10, 4  ;;  %s344_s3 = scalar_lea.hbm %s4865_s1, %s3105_s15  ;;  %s326_s17 = int_to_ptr.vmem [resolvable:$true] %s325_s17 }
  0x2e   : > { %s345_s4 = sshll.u32 %s344_s3, 4  ;;  %s314_s7 = scalar_lea.sflag [#allocation3], %s313_s21  ;;  %s346_s4 = int_to_ptr.hbm [resolvable:$true] %s345_s4 }
  0x2f   : > { %p3614_p10 = pneg %p3919_p9 }
  0x31   : > { %s322_s26 = scalar_lea.hbm %s4894_s0, %s3105_s15  ;;  %s3617_s10 = scalar_lea.hbm %s4894_s0, 128 }
  0x32   : > { %s323_s20 = sshll.u32 %s322_s26, 4  ;;  %s324_s20 = int_to_ptr.hbm [resolvable:$true] %s323_s20 }
  0x33   : > { %s3610_s18 = sshra.s32 %s324_s20, 4  ;;  %s3611_s18 = int_to_ptr.hbm [resolvable:$true] %s3610_s18 }
  0x34   : > { %s3612_s22 = scalar_lea.hbm %s3611_s18, 64  ;;  %p3618_p0 = scmp.lt.s32.totalorder %s3611_s18, %s4894_s0 }
  0x35   : > { %p3613_p2 = scmp.ne.s32.totalorder %s3611_s18, %s3612_s22  ;;  %p3619_p3 = scmp.lt.s32.totalorder %s3617_s10, %s3612_s22 }
  0x37   : > { %p3615_p12 = pnand %p3614_p10, %p3613_p2  ;;  %p3620_p7 = por %p3619_p3, %p3618_p0 }
  0x39   : > { %p3616_p13 = pneg %p3615_p12 }
  0x3b   : > { %p3621_p11 = pnand %p3620_p7, %p3616_p13 }
  0x3d   : > { %3624 = shalt.err (!%p3621_p11)
}
  0x3e   : > { %s4896_s3 = smov 4   ;;  %s4897_s21 = smov 64  }
  0x3f   : > { %3227 = dma.hbm_to_vmem [thread:$0]  (!%p3919_p9), %s324_s20, 1024, %s326_s17, %s314_s7, %s4897_s21, %s4897_s21, %s4896_s3  }
  0x40   : > { %s339_s15 = scalar_lea.vmem [#allocation5], %s3912_s19  ;;  %s335_s26 = sand.u32 1, %s3752_s30  }
  0x41   : > { %s347_s25 = sshll.u32 %s339_s15, 4  ;;  %s336_s2 = scalar_lea.sflag [#allocation6], %s335_s26  ;;  %s348_s25 = int_to_ptr.vmem [resolvable:$true] %s347_s25 }
  0x42   : > { %s3640_s18 = sshra.s32 %s346_s4, 4  ;;  %s3647_s0 = scalar_lea.hbm %s4865_s1, 128  ;;  %s3641_s18 = int_to_ptr.hbm [resolvable:$true] %s3640_s18 }
  0x43   : > { %s3642_s22 = scalar_lea.hbm %s3641_s18, 64  ;;  %p3648_p13 = scmp.lt.s32.totalorder %s3641_s18, %s4865_s1 }
  0x44   : > { %p3643_p2 = scmp.ne.s32.totalorder %s3641_s18, %s3642_s22  ;;  %p3649_p0 = scmp.lt.s32.totalorder %s3647_s0, %s3642_s22 }
  0x46   : > { %p3645_p11 = pnand %p3643_p2, %p3614_p10  ;;  %p3650_p3 = por %p3649_p0, %p3648_p13 }
  0x48   : > { %p3646_p12 = pneg %p3645_p11 }
  0x4a   : > { %p3651_p7 = pnand %p3650_p3, %p3646_p12 }
  0x4c   : > { %3654 = shalt.err (!%p3651_p7)
}
  0x4d   : > { %3230 = dma.hbm_to_vmem [thread:$0]  (!%p3919_p9), %s346_s4, 1024, %s348_s25, %s336_s2, %s4897_s21, %s4897_s21, %s4896_s3  }
  0x4e   : > { %359 = sbr.rel (%p3853_p8) target bundleno = 1539 (0x603), region = 52  ;;  %s3961_s19 = sand.u32 (!%p3853_p8), 1, %s3744_s28  }
  0x4f   : > { %s2802_s29 = sshll.u32 (!%p3853_p8), %s3961_s19, 6  ;;  %s362_s0 = scalar_lea.sflag (!%p3853_p8), [#allocation3], %s3961_s19 }
  0x50   : > { %s3965_s17 = scalar_lea.vmem (!%p3853_p8), [#allocation2], %s2802_s29 }
  0x53   : > { %3715 = dma.done.wait (%p3840_p4), %s362_s0, 1024  }
  0x54   : > { %3717 = vsyncadd (%p3840_p4), %s362_s0, 4294966272  ;;  %s371_s4 = sand.u32 1, %s3831_s9   ;;  %s3972_s23 = scalar_lea.vmem [#allocation5], %s2802_s29 }
  0x55   : > { %s372_s16 = scalar_lea.sflag [#allocation6], %s371_s4 }
  0x56   : > { %3719 = dma.done.wait (%p3840_p4), %s372_s16, 1024  }
  0x57   : > { %3721 = vsyncadd (%p3840_p4), %s372_s16, 4294966272 }
  0x58   : > { %3723 = dma.done.wait (%p50_p1), [#allocation6], 1024  }
  0x59   : > { %3725 = vsyncadd (%p50_p1), [#allocation6], 4294966272 }
  0x5a   : > { %3727 = dma.done.wait (%p50_p1), [#allocation9], 3072  }
  0x5b   : > { %3729 = vsyncadd (%p50_p1), [#allocation9], 4294964224 }
  0x5c   : > { %3731 = dma.done.wait (%p50_p1), [#allocation12], 2048  }
  0x5d   : > { %3733 = vsyncadd (%p50_p1), [#allocation12], 4294965248  ;;  %v3138_v0 = vld [vmem:[#allocation8 + $0x38] sm:$0xff]  ;;  %v3137_v2 = vld [vmem:[#allocation8 + $0x30] sm:$0xff]  ;;  %s2808_s7 = sshll.u32 %s3961_s19, 8  ;;  %s2638_s25 = scalar_lea.sflag [#allocation4], %s3961_s19 }
  0x5e   : > { %v3122_v1 = vld [vmem:[#allocation7 + $0x38] sm:$0xff]  ;;  %597 = vmatpush.bf16.msra.mxu0 %v3138_v0  ;;  %v3121_v3 = vld [vmem:[#allocation7 + $0x30] sm:$0xff]  ;;  %3173 = vmatpush.bf16.msra.mxu2 %v3138_v0  ;;  %v3136_v4 = vld [vmem:[#allocation8 + $0x28] sm:$0xff]  ;;  %s4742_s29 = scalar_lea.vmem [#allocation13], %s2808_s7  ;;  %s3690_s22 = scalar_lea.hbm %s4872_s8, 512 }
  0x5f   : > { %742 = vmatpush.bf16.msra.mxu1 %v3122_v1  ;;  %3181 = vmatpush.bf16.msra.mxu3 %v3122_v1  ;;  %v3120_v5 = vld [vmem:[#allocation7 + $0x28] sm:$0xff]  ;;  %v3135_v6 = vld [vmem:[#allocation8 + $0x20] sm:$0xff]  ;;  %v3134_v8 = vld [vmem:[#allocation8 + $0x18] sm:$0xff]  ;;  %s2651_s21 = sshll.u32 %s4742_s29, 4  ;;  %s2652_s21 = int_to_ptr.vmem [resolvable:$true] %s2651_s21 }
  0x60   : > { %v3119_v7 = vld [vmem:[#allocation7 + $0x20] sm:$0xff]  ;;  %v3118_v9 = vld [vmem:[#allocation7 + $0x18] sm:$0xff]  ;;  %v3133_v10 = vld [vmem:[#allocation8 + $0x10] sm:$0xff] }
  0x61   : > { %v3117_v11 = vld [vmem:[#allocation7 + $0x10] sm:$0xff]  ;;  %v3132_v12 = vld [vmem:[#allocation8 + $0x8] sm:$0xff]  ;;  %v3131_v14 = vld [vmem:[#allocation8] sm:$0xff] }
  0x62   : > { %598 = vmatpush.bf16.msra.mxu0 %v3137_v2  ;;  %3174 = vmatpush.bf16.msra.mxu2 %v3137_v2  ;;  %v3116_v13 = vld [vmem:[#allocation7 + $0x8] sm:$0xff]  ;;  %v3115_v15 = vld [vmem:[#allocation7] sm:$0xff]  ;;  %v3146_v22 = vld [vmem:[#allocation10 + $0x38] sm:$0xff] }
  0x63   : > { %743 = vmatpush.bf16.msra.mxu1 %v3121_v3  ;;  %3182 = vmatpush.bf16.msra.mxu3 %v3121_v3  ;;  %v3123_v16 = vld [vmem:[%s3972_s23] sm:$0xff]  ;;  %v3124_v18 = vld [vmem:[%s3972_s23 + $0x8] sm:$0xff]  ;;  %v3145_v23 = vld [vmem:[#allocation10 + $0x30] sm:$0xff] }
  0x64   : > { %v3107_v17 = vld [vmem:[%s3965_s17] sm:$0xff]  ;;  %v3108_v19 = vld [vmem:[%s3965_s17 + $0x8] sm:$0xff]  ;;  %v3125_v26 = vld [vmem:[%s3972_s23 + $0x10] sm:$0xff] }
  0x65   : > { %v3127_v20 = vld [vmem:[%s3972_s23 + $0x20] sm:$0xff]  ;;  %v3144_v24 = vld [vmem:[#allocation10 + $0x28] sm:$0xff]  ;;  %v3109_v27 = vld [vmem:[%s3965_s17 + $0x10] sm:$0xff] }
  0x66   : > { %599 = vmatpush.bf16.msra.mxu0 %v3136_v4  ;;  %3175 = vmatpush.bf16.msra.mxu2 %v3136_v4  ;;  %v3111_v21 = vld [vmem:[%s3965_s17 + $0x20] sm:$0xff]  ;;  %v3128_v28 = vld [vmem:[%s3972_s23 + $0x28] sm:$0xff]  ;;  %v3142_v30 = vld [vmem:[#allocation10 + $0x18] sm:$0xff] }
  0x67   : > { %744 = vmatpush.bf16.msra.mxu1 %v3120_v5  ;;  %3183 = vmatpush.bf16.msra.mxu3 %v3120_v5  ;;  %v3143_v25 = vld [vmem:[#allocation10 + $0x20] sm:$0xff]  ;;  %v3112_v29 = vld [vmem:[%s3965_s17 + $0x28] sm:$0xff]  ;;  %v3141_v31 = vld [vmem:[#allocation10 + $0x10] sm:$0xff] }
  0x68   : > { %v3140_v32 = vld [vmem:[#allocation10 + $0x8] sm:$0xff]  ;;  %v3126_v33 = vld [vmem:[%s3972_s23 + $0x18] sm:$0xff]  ;;  %v3129_v35 = vld [vmem:[%s3972_s23 + $0x30] sm:$0xff] }
  0x69   : > { %v3110_v34 = vld [vmem:[%s3965_s17 + $0x18] sm:$0xff]  ;;  %v3113_v36 = vld [vmem:[%s3965_s17 + $0x30] sm:$0xff]  ;;  %v3139_v39 = vld [vmem:[#allocation10] sm:$0xff] }
  0x6a   : > { %600 = vmatpush.bf16.msra.mxu0 %v3135_v6  ;;  %3176 = vmatpush.bf16.msra.mxu2 %v3135_v6  ;;  %v3130_v37 = vld [vmem:[%s3972_s23 + $0x38] sm:$0xff]  ;;  %s3172_s23 = sshll.u32 %s3831_s9, 8 }
  0x6b   : > { %745 = vmatpush.bf16.msra.mxu1 %v3119_v7  ;;  %3184 = vmatpush.bf16.msra.mxu3 %v3119_v7  ;;  %v3114_v38 = vld [vmem:[%s3965_s17 + $0x38] sm:$0xff]  ;;  %s2650_s3 = scalar_lea.hbm %s4872_s8, %s3172_s23 }
  0x6c   : > { %s2653_s15 = sshll.u32 %s2650_s3, 4  ;;  %s2654_s15 = int_to_ptr.hbm [resolvable:$true] %s2653_s15 }
  0x6d   : > { %s3684_s26 = sshra.s32 %s2654_s15, 4  ;;  %s3685_s26 = int_to_ptr.hbm [resolvable:$true] %s3684_s26 }
  0x6e   : > { %601 = vmatpush.bf16.msra.mxu0 %v3134_v8  ;;  %3177 = vmatpush.bf16.msra.mxu2 %v3134_v8  ;;  %s3686_s9 = scalar_lea.hbm %s3685_s26, 256  ;;  %p3691_p9 = scmp.lt.s32.totalorder %s3685_s26, %s4872_s8 }
  0x6f   : > { %746 = vmatpush.bf16.msra.mxu1 %v3118_v9  ;;  %3185 = vmatpush.bf16.msra.mxu3 %v3118_v9  ;;  %p3687_p1 = scmp.ne.s32.totalorder %s3685_s26, %s3686_s9  ;;  %p3692_p10 = scmp.lt.s32.totalorder %s3690_s22, %s3686_s9 }
  0x71   : > { %p3688_p4 = pnand %p3687_p1, %p3906_p5  ;;  %p3693_p2 = por %p3692_p10, %p3691_p9 }
  0x72   : > { %602 = vmatpush.bf16.msra.mxu0 %v3133_v10  ;;  %3178 = vmatpush.bf16.msra.mxu2 %v3133_v10 }
  0x73   : > { %747 = vmatpush.bf16.msra.mxu1 %v3117_v11  ;;  %3186 = vmatpush.bf16.msra.mxu3 %v3117_v11  ;;  %p3689_p8 = pneg %p3688_p4 }
  0x75   : > { %p3694_p11 = pnand %p3693_p2, %p3689_p8 }
  0x76   : > { %603 = vmatpush.bf16.msra.mxu0 %v3132_v12  ;;  %3179 = vmatpush.bf16.msra.mxu2 %v3132_v12 }
  0x77   : > { %748 = vmatpush.bf16.msra.mxu1 %v3116_v13  ;;  %3187 = vmatpush.bf16.msra.mxu3 %v3116_v13 }
  0x7a   : > { %604 = vmatpush.bf16.msra.mxu0 %v3131_v14  ;;  %3180 = vmatpush.bf16.msra.mxu2 %v3131_v14 }
  0x7b   : > { %749 = vmatpush.bf16.msra.mxu1 %v3115_v15  ;;  %3188 = vmatpush.bf16.msra.mxu3 %v3115_v15 }
  0x7d   : > { %605 = vmatmul.bf16.vlgmr.msra.gmra.mxu0 %v3123_v16  ;;  %625 = vmatmul.bf16.vlgmr.msra.gmra.mxu2 %v3127_v20 }
  0x7e   : > { %750 = vmatmul.bf16.vlgmr.msra.gmra.mxu1 %v3107_v17  ;;  %770 = vmatmul.bf16.vlgmr.msra.gmra.mxu3 %v3111_v21 }
  0x7f   : > { %863 = vmatpush.bf16.msrb.mxu2 %v3146_v22 }
  0x83   : > { %864 = vmatpush.bf16.msrb.mxu2 %v3145_v23 }
  0x87   : > { %865 = vmatpush.bf16.msrb.mxu2 %v3144_v24 }
  0x8b   : > { %866 = vmatpush.bf16.msrb.mxu2 %v3143_v25 }
  0x8d   : > { %610 = vmatmul.bf16.gmra.mxu0 %v3124_v18  ;;  %630 = vmatmul.bf16.gmra.mxu2 %v3128_v28 }
  0x8e   : > { %755 = vmatmul.bf16.gmra.mxu1 %v3108_v19  ;;  %775 = vmatmul.bf16.gmra.mxu3 %v3112_v29 }
  0x8f   : > { %867 = vmatpush.bf16.msrb.mxu2 %v3142_v30 }
  0x93   : > { %868 = vmatpush.bf16.msrb.mxu2 %v3141_v31 }
  0x97   : > { %869 = vmatpush.bf16.msrb.mxu2 %v3140_v32 }
  0x9b   : > { %870 = vmatpush.bf16.msrb.mxu2 %v3139_v39  ;;  %v3762_v39 = vmov 128.0  }
  0x9c   : > { %3292 = vrcp.f32 %v3762_v39 }
  0x9d   : > { %615 = vmatmul.bf16.gmra.mxu0 %v3125_v26  ;;  %635 = vmatmul.bf16.gmra.mxu2 %v3129_v35 }
  0x9e   : > { %760 = vmatmul.bf16.gmra.mxu1 %v3109_v27  ;;  %780 = vmatmul.bf16.gmra.mxu3 %v3113_v36 }
  0xad   : > { %620 = vmatmul.bf16.gmra.mxu0 %v3126_v33  ;;  %640 = vmatmul.bf16.gmra.mxu2 %v3130_v37 }
  0xae   : > { %765 = vmatmul.bf16.gmra.mxu1 %v3110_v34  ;;  %785 = vmatmul.bf16.gmra.mxu3 %v3114_v38 }
  0xfa   : > { %v606_v40 = vpop.f32.mrf.mxu0 }
  0xfb   : > { %v751_v41 = vpop.f32.mrf.mxu1 }
  0xfc   : > { %v752_v44 = vadd.f32 %v751_v41, %v606_v40  ;;  %v3293_v40 = vpop.eup %3292 }
  0xfd   : > { %v945_v41 = vmul.f32 128.0, %v3293_v40  ;;  %vm949_vm0 = vweird.f32 %v3293_v40 }
 0x100   : > { %v626_v61 = vpop.f32.mrf.mxu2 }
 0x101   : > { %v771_v62 = vpop.f32.mrf.mxu3 }
 0x102   : > { %v608_v42 = vpop.f32.mrf.mxu0  ;;  %v772_v10 = vadd.f32 %v771_v62, %v626_v61 }
 0x103   : > { %v753_v43 = vpop.f32.mrf.mxu1 }
 0x104   : > { %v754_v45 = vadd.f32 %v753_v43, %v608_v42  ;;  %v946_v42 = vsub.f32 1.0, %v945_v41 }
 0x106   : > { %v791_v46 = vpack.c.bf16 %v754_v45, %v752_v44  ;;  %v947_v43 = vmul.f32 %v3293_v40, %v946_v42 }
 0x108   : > { %871 = vmatmul.bf16.vlgmr.msrb.gmra.mxu2 %v791_v46  ;;  %v628_v1 = vpop.f32.mrf.mxu2  ;;  %v948_v44 = vadd.f32 %v3293_v40, %v947_v43 }
 0x109   : > { %v773_v2 = vpop.f32.mrf.mxu3 }
 0x10a   : > { %v611_v47 = vpop.f32.mrf.mxu0  ;;  %v774_v11 = vadd.f32 %v773_v2, %v628_v1  ;;  %v4006_v45 = vsel %vm949_vm0, %v3293_v40, %v948_v44 }
 0x10b   : > { %v756_v48 = vpop.f32.mrf.mxu1 }
 0x10c   : > { %v757_v51 = vadd.f32 %v756_v48, %v611_v47  ;;  %v795_v12 = vpack.c.bf16 %v774_v11, %v772_v10 }
 0x110   : > { %v631_v8 = vpop.f32.mrf.mxu2 }
 0x111   : > { %v776_v9 = vpop.f32.mrf.mxu3 }
 0x112   : > { %v613_v49 = vpop.f32.mrf.mxu0  ;;  %v777_v17 = vadd.f32 %v776_v9, %v631_v8 }
 0x113   : > { %v758_v50 = vpop.f32.mrf.mxu1 }
 0x114   : > { %v759_v52 = vadd.f32 %v758_v50, %v613_v49 }
 0x116   : > { %v792_v53 = vpack.c.bf16 %v759_v52, %v757_v51 }
 0x118   : > { %876 = vmatmul.bf16.gmra.mxu2 %v792_v53  ;;  %v633_v13 = vpop.f32.mrf.mxu2 }
 0x119   : > { %v778_v14 = vpop.f32.mrf.mxu3 }
 0x11a   : > { %v616_v54 = vpop.f32.mrf.mxu0  ;;  %v779_v18 = vadd.f32 %v778_v14, %v633_v13 }
 0x11b   : > { %v761_v55 = vpop.f32.mrf.mxu1 }
 0x11c   : > { %v762_v56 = vadd.f32 %v761_v55, %v616_v54  ;;  %v796_v19 = vpack.c.bf16 %v779_v18, %v777_v17  ;;  %v3154_v18 = vld [vmem:[#allocation10 + $0x78] sm:$0xff] }
 0x11d   : > { %1672 = vmatpush.bf16.msrb.mxu3 %v3154_v18 }
 0x120   : > { %v636_v15 = vpop.f32.mrf.mxu2 }
 0x121   : > { %v781_v16 = vpop.f32.mrf.mxu3 }
 0x122   : > { %v618_v57 = vpop.f32.mrf.mxu0  ;;  %v782_v22 = vadd.f32 %v781_v16, %v636_v15 }
 0x123   : > { %v763_v58 = vpop.f32.mrf.mxu1 }
 0x124   : > { %v764_v59 = vadd.f32 %v763_v58, %v618_v57 }
 0x126   : > { %v793_v60 = vpack.c.bf16 %v764_v59, %v762_v56 }
 0x128   : > { %881 = vmatmul.bf16.gmra.mxu2 %v793_v60  ;;  %v638_v20 = vpop.f32.mrf.mxu2 }
 0x129   : > { %v783_v21 = vpop.f32.mrf.mxu3 }
 0x12a   : > { %v621_v63 = vpop.f32.mrf.mxu0  ;;  %v784_v23 = vadd.f32 %v783_v21, %v638_v20 }
 0x12b   : > { %v766_v0 = vpop.f32.mrf.mxu1 }
 0x12c   : > { %v767_v3 = vadd.f32 %v766_v0, %v621_v63  ;;  %v797_v26 = vpack.c.bf16 %v784_v23, %v782_v22  ;;  %v3152_v23 = vld [vmem:[#allocation10 + $0x68] sm:$0xff] }
 0x130   : > { %v641_v24 = vpop.f32.mrf.mxu2 }
 0x131   : > { %v786_v25 = vpop.f32.mrf.mxu3 }
 0x132   : > { %v623_v4 = vpop.f32.mrf.mxu0  ;;  %v787_v29 = vadd.f32 %v786_v25, %v641_v24 }
 0x133   : > { %v768_v5 = vpop.f32.mrf.mxu1 }
 0x134   : > { %v769_v6 = vadd.f32 %v768_v5, %v623_v4 }
 0x136   : > { %v794_v7 = vpack.c.bf16 %v769_v6, %v767_v3 }
 0x138   : > { %886 = vmatmul.bf16.gmra.mxu2 %v794_v7  ;;  %v643_v27 = vpop.f32.mrf.mxu2 }
 0x139   : > { %v788_v28 = vpop.f32.mrf.mxu3 }
 0x13a   : > { %v789_v30 = vadd.f32 %v788_v28, %v643_v27 }
 0x13c   : > { %v798_v31 = vpack.c.bf16 %v789_v30, %v787_v29 }
 0x148   : > { %891 = vmatmul.bf16.gmra.mxu2 %v795_v12 }
 0x158   : > { %896 = vmatmul.bf16.gmra.mxu2 %v796_v19  ;;  %v3153_v19 = vld [vmem:[#allocation10 + $0x70] sm:$0xff] }
 0x159   : > { %1673 = vmatpush.bf16.msrb.mxu3 %v3153_v19 }
 0x15d   : > { %1674 = vmatpush.bf16.msrb.mxu3 %v3152_v23 }
 0x168   : > { %901 = vmatmul.bf16.gmra.mxu2 %v797_v26 }
 0x178   : > { %906 = vmatmul.bf16.gmra.mxu2 %v798_v31 }
 0x18b   : > { %v872_v32 = vpop.f32.mrf.mxu2 }
 0x18c   : > { %912 = vadd.xlane.f32.xlu0 %v872_v32 }
 0x193   : > { %v874_v33 = vpop.f32.mrf.mxu2 }
 0x194   : > { %914 = vadd.xlane.f32.xlu0 %v874_v33 }
 0x19b   : > { %v877_v34 = vpop.f32.mrf.mxu2 }
 0x19c   : > { %916 = vadd.xlane.f32.xlu1 %v877_v34 }
 0x1a3   : > { %v879_v35 = vpop.f32.mrf.mxu2 }
 0x1a4   : > { %918 = vadd.xlane.f32.xlu1 %v879_v35 }
 0x1ab   : > { %v882_v36 = vpop.f32.mrf.mxu2 }
 0x1ac   : > { %920 = vadd.xlane.f32.xlu2 %v882_v36 }
 0x1b3   : > { %v884_v37 = vpop.f32.mrf.mxu2 }
 0x1b4   : > { %922 = vadd.xlane.f32.xlu2 %v884_v37 }
 0x1bb   : > { %v887_v38 = vpop.f32.mrf.mxu2 }
 0x1bc   : > { %924 = vadd.xlane.f32.xlu2 %v887_v38 }
 0x1c3   : > { %v4008_v46 = vpop.f32.mrf.mxu2 }
 0x1cb   : > { %v4016_v53 = vpop.f32.mrf.mxu2 }
 0x1d3   : > { %v4026_v59 = vpop.f32.mrf.mxu2 }
 0x1db   : > { %v4036_v1 = vpop.f32.mrf.mxu2 }
 0x1e3   : > { %v4045_v6 = vpop.f32.mrf.mxu2 }
 0x1eb   : > { %v4054_v13 = vpop.f32.mrf.mxu2 }
 0x1f3   : > { %v4061_v16 = vpop.f32.mrf.mxu2 }
 0x1fb   : > { %v4064_v17 = vpop.f32.mrf.mxu2 }
 0x1ff   : > { %v913_v47 = vpop.xlane.xlu0 %912 }
 0x200   : > { %v951_v48 = vmul.f32 %v4006_v45, %v913_v47  ;;  %v3150_v47 = vld [vmem:[#allocation10 + $0x58] sm:$0xff] }
 0x202   : > { %v4011_v49 = vsub.f32 %v872_v32, %v951_v48 }
 0x203   : > { %v4112_v19 = vpop.f32.mrf.mxu2 }
 0x204   : > { %v983_v50 = vmul.f32 %v4011_v49, %v4011_v49 }
 0x206   : > { %999 = vadd.xlane.f32.xlu0 %v983_v50  ;;  %v4088_v50 = vld [vmem:[%s4869_s5] ss:$0 sm:$0xff] }
 0x207   : > { %v915_v51 = vpop.xlane.xlu0 %914 }
 0x208   : > { %v952_v52 = vmul.f32 %v4006_v45, %v915_v51 }
 0x20a   : > { %v4018_v54 = vsub.f32 %v874_v33, %v952_v52 }
 0x20c   : > { %v984_v55 = vmul.f32 %v4018_v54, %v4018_v54 }
 0x20e   : > { %1001 = vadd.xlane.f32.xlu1 %v984_v55  ;;  %926 = vadd.xlane.f32.xlu0 %v4008_v46  ;;  %v4094_v55 = vld [vmem:[%s4870_s6] ss:$0 sm:$0xff] }
 0x20f   : > { %v917_v56 = vpop.xlane.xlu1 %916 }
 0x210   : > { %v953_v57 = vmul.f32 %v4006_v45, %v917_v56 }
 0x212   : > { %v4024_v58 = vsub.f32 %v877_v34, %v953_v57  ;;  %v3151_v34 = vld [vmem:[#allocation10 + $0x60] sm:$0xff] }
 0x213   : > { %1675 = vmatpush.bf16.msrb.mxu3 %v3151_v34 }
 0x214   : > { %v985_v60 = vmul.f32 %v4024_v58, %v4024_v58 }
 0x216   : > { %1003 = vadd.xlane.f32.xlu1 %v985_v60  ;;  %928 = vadd.xlane.f32.xlu0 %v4016_v53 }
 0x217   : > { %v919_v61 = vpop.xlane.xlu1 %918  ;;  %1676 = vmatpush.bf16.msrb.mxu3 %v3150_v47 }
 0x218   : > { %v954_v62 = vmul.f32 %v4006_v45, %v919_v61  ;;  %v3149_v61 = vld [vmem:[#allocation10 + $0x50] sm:$0xff] }
 0x21a   : > { %v4032_v63 = vsub.f32 %v879_v35, %v954_v62 }
 0x21b   : > { %1677 = vmatpush.bf16.msrb.mxu3 %v3149_v61 }
 0x21c   : > { %v986_v0 = vmul.f32 %v4032_v63, %v4032_v63 }
 0x21e   : > { %1005 = vadd.xlane.f32.xlu2 %v986_v0  ;;  %930 = vadd.xlane.f32.xlu1 %v4026_v59 }
 0x21f   : > { %v921_v2 = vpop.xlane.xlu2 %920 }
 0x220   : > { %v955_v3 = vmul.f32 %v4006_v45, %v921_v2 }
 0x222   : > { %v4040_v4 = vsub.f32 %v882_v36, %v955_v3 }
 0x224   : > { %v987_v5 = vmul.f32 %v4040_v4, %v4040_v4 }
 0x226   : > { %1007 = vadd.xlane.f32.xlu2 %v987_v5  ;;  %932 = vadd.xlane.f32.xlu1 %v4036_v1 }
 0x227   : > { %v923_v7 = vpop.xlane.xlu2 %922 }
 0x228   : > { %v956_v8 = vmul.f32 %v4006_v45, %v923_v7 }
 0x22a   : > { %v4048_v9 = vsub.f32 %v884_v37, %v956_v8 }
 0x22c   : > { %v988_v10 = vmul.f32 %v4048_v9, %v4048_v9 }
 0x22e   : > { %1009 = vadd.xlane.f32.xlu0 %v988_v10  ;;  %934 = vadd.xlane.f32.xlu2 %v4045_v6 }
 0x22f   : > { %v925_v11 = vpop.xlane.xlu2 %924 }
 0x230   : > { %v957_v12 = vmul.f32 %v4006_v45, %v925_v11 }
 0x232   : > { %v4056_v14 = vsub.f32 %v887_v38, %v957_v12  ;;  %v3148_v12 = vld [vmem:[#allocation10 + $0x48] sm:$0xff] }
 0x233   : > { %1678 = vmatpush.bf16.msrb.mxu3 %v3148_v12 }
 0x234   : > { %v989_v15 = vmul.f32 %v4056_v14, %v4056_v14 }
 0x236   : > { %1011 = vadd.xlane.f32.xlu0 %v989_v15  ;;  %936 = vadd.xlane.f32.xlu2 %v4054_v13 }
 0x23e   : > { %938 = vadd.xlane.f32.xlu0 %v4061_v16 }
 0x246   : > { %940 = vadd.xlane.f32.xlu0 %v4064_v17 }
 0x279   : > { %v1000_v20 = vpop.xlane.xlu0 %999 }
 0x27a   : > { %v1031_v21 = vmul.f32 %v1000_v20, %v4006_v45 }
 0x27c   : > { %v1047_v22 = vadd.f32 1e-05, %v1031_v21 }
 0x27e   : > { %3294 = vrsqrt.f32 %v1047_v22  ;;  %vm1069_vm2 = vweird.f32 %v1047_v22 }
 0x281   : > { %v1002_v24 = vpop.xlane.xlu1 %1001  ;;  %v927_v25 = vpop.xlane.xlu0 %926 }
 0x282   : > { %v1032_v26 = vmul.f32 %v1002_v24, %v4006_v45  ;;  %v958_v27 = vmul.f32 %v4006_v45, %v927_v25  ;;  %v3147_v25 = vld [vmem:[#allocation10 + $0x40] sm:$0xff] }
 0x283   : > { %1679 = vmatpush.bf16.msrb.mxu3 %v3147_v25 }
 0x284   : > { %v3295_v28 = vpop.eup %3294  ;;  %v1048_v29 = vadd.f32 1e-05, %v1032_v26  ;;  %v4071_v30 = vsub.f32 %v4008_v46, %v958_v27 }
 0x285   : > { %v1064_v31 = vmul.f32 %v3295_v28, %v1047_v22  ;;  %vm1070_vm1 = vweird.f32 %v3295_v28 }
 0x286   : > { %3296 = vrsqrt.f32 %v1048_v29  ;;  %v990_v32 = vmul.f32 %v4071_v30, %v4071_v30  ;;  %vm1071_vm3 = vmor %vm1069_vm2, %vm1070_vm1  ;;  %vm1079_vm5 = vweird.f32 %v1048_v29 }
 0x287   : > { %v1065_v33 = vmul.f32 %v3295_v28, %v1064_v31 }
 0x288   : > { %1013 = vadd.xlane.f32.xlu1 %v990_v32 }
 0x289   : > { %v1066_v35 = vmul.f32 0.5, %v1065_v33  ;;  %v1004_v36 = vpop.xlane.xlu1 %1003  ;;  %v929_v37 = vpop.xlane.xlu0 %928 }
 0x28a   : > { %v1033_v38 = vmul.f32 %v1004_v36, %v4006_v45  ;;  %v959_v39 = vmul.f32 %v4006_v45, %v929_v37 }
 0x28b   : > { %v1067_v40 = vsub.f32 1.5, %v1066_v35 }
 0x28c   : > { %v3297_v41 = vpop.eup %3296  ;;  %v4077_v42 = vadd.f32 1e-05, %v1033_v38  ;;  %v4080_v43 = vsub.f32 %v4016_v53, %v959_v39 }
 0x28d   : > { %v1068_v44 = vmul.f32 %v3295_v28, %v1067_v40  ;;  %v1074_v46 = vmul.f32 %v3297_v41, %v1048_v29  ;;  %vm1080_vm4 = vweird.f32 %v3297_v41 }
 0x28e   : > { %3298 = vrsqrt.f32 %v4077_v42  ;;  %v991_v48 = vmul.f32 %v4080_v43, %v4080_v43  ;;  %vm1081_vm6 = vmor %vm1079_vm5, %vm1080_vm4  ;;  %vm1089_vm8 = vweird.f32 %v4077_v42 }
 0x28f   : > { %v1072_v51 = vsel %vm1071_vm3, %v3295_v28, %v1068_v44  ;;  %v1075_v52 = vmul.f32 %v3297_v41, %v1074_v46 }
 0x290   : > { %v1223_v53 = vmul.f32 %v1072_v51, %v4011_v49  ;;  %1015 = vadd.xlane.f32.xlu1 %v991_v48 }
 0x291   : > { %v1076_v56 = vmul.f32 0.5, %v1075_v52  ;;  %v1006_v57 = vpop.xlane.xlu2 %1005  ;;  %v931_v60 = vpop.xlane.xlu1 %930 }
 0x292   : > { %v1034_v62 = vmul.f32 %v1006_v57, %v4006_v45  ;;  %v960_v0 = vmul.f32 %v4006_v45, %v931_v60  ;;  %v1243_v2 = vmul.f32 %v4088_v50, %v1223_v53 }
 0x293   : > { %v1077_v3 = vsub.f32 1.5, %v1076_v56 }
 0x294   : > { %v3299_v49 = vpop.eup %3298  ;;  %v4099_v5 = vadd.f32 1e-05, %v1034_v62  ;;  %v4102_v7 = vsub.f32 %v4026_v59, %v960_v0  ;;  %v4105_v8 = vadd.f32 %v4094_v55, %v1243_v2 }
 0x295   : > { %v1078_v10 = vmul.f32 %v3297_v41, %v1077_v3  ;;  %v1084_v11 = vmul.f32 %v3299_v49, %v4077_v42  ;;  %vm1090_vm7 = vweird.f32 %v3299_v49 }
 0x296   : > { %3300 = vrsqrt.f32 %v4099_v5  ;;  %v992_v15 = vmul.f32 %v4102_v7, %v4102_v7  ;;  %v2969_v18 = vmul.f32 -1.442695, %v4105_v8  ;;  %vm1091_vm9 = vmor %vm1089_vm8, %vm1090_vm7  ;;  %vm1099_vm11 = vweird.f32 %v4099_v5 }
 0x297   : > { %v1082_v59 = vsel %vm1081_vm6, %v3297_v41, %v1078_v10  ;;  %v1085_v20 = vmul.f32 %v3299_v49, %v1084_v11 }
 0x298   : > { %v1224_v21 = vmul.f32 %v1082_v59, %v4018_v54  ;;  %1017 = vadd.xlane.f32.xlu2 %v992_v15  ;;  %942 = vadd.xlane.f32.xlu1 %v4112_v19  ;;  %3302 = vpow2.f32 %v2969_v18 }
 0x299   : > { %v1086_v22 = vmul.f32 0.5, %v1085_v20  ;;  %v1008_v23 = vpop.xlane.xlu2 %1007  ;;  %v933_v24 = vpop.xlane.xlu1 %932 }
 0x29a   : > { %v1035_v26 = vmul.f32 %v1008_v23, %v4006_v45  ;;  %v961_v27 = vmul.f32 %v4006_v45, %v933_v24  ;;  %v1244_v28 = vmul.f32 %v4088_v50, %v1224_v21 }
 0x29b   : > { %v1087_v29 = vsub.f32 1.5, %v1086_v22 }
 0x29c   : > { %v3301_v31 = vpop.eup %3300  ;;  %v4119_v32 = vadd.f32 1e-05, %v1035_v26  ;;  %v4122_v54 = vsub.f32 %v4036_v1, %v961_v27  ;;  %v4125_v33 = vadd.f32 %v4094_v55, %v1244_v28 }
 0x29d   : > { %v1088_v34 = vmul.f32 %v3299_v49, %v1087_v29  ;;  %v1094_v35 = vmul.f32 %v3301_v31, %v4099_v5  ;;  %vm1100_vm10 = vweird.f32 %v3301_v31 }
 0x29e   : > { %v3303_v36 = vpop.eup %3302  ;;  %3304 = vrsqrt.f32 %v4119_v32  ;;  %v993_v37 = vmul.f32 %v4122_v54, %v4122_v54  ;;  %v2970_v38 = vmul.f32 -1.442695, %v4125_v33  ;;  %vm1101_vm12 = vmor %vm1099_vm11, %vm1100_vm10  ;;  %vm1109_vm14 = vweird.f32 %v4119_v32 }
 0x29f   : > { %v1092_v39 = vsel %vm1091_vm9, %v3299_v49, %v1088_v34  ;;  %v1095_v1 = vmul.f32 %v3301_v31, %v1094_v35  ;;  %v4133_v40 = vadd.f32 1.0, %v3303_v36 }
 0x2a0   : > { %1019 = vadd.xlane.f32.xlu2 %v993_v37  ;;  %3306 = vpow2.f32 %v2970_v38  ;;  %v1225_v41 = vmul.f32 %v1092_v39, %v4024_v58 }
 0x2a1   : > { %v1096_v42 = vmul.f32 0.5, %v1095_v1  ;;  %v1010_v44 = vpop.xlane.xlu0 %1009  ;;  %v935_v46 = vpop.xlane.xlu2 %934  ;;  %3308 = vrcp.f32 %v4133_v40  ;;  %vm1348_vm0 = vweird.f32 %v4133_v40 }
 0x2a2   : > { %v1036_v47 = vmul.f32 %v1010_v44, %v4006_v45  ;;  %v962_v48 = vmul.f32 %v4006_v45, %v935_v46  ;;  %v1245_v51 = vmul.f32 %v4088_v50, %v1225_v41  ;;  %v1352_v41 = vand.u32 2147483647, %v4133_v40 }
 0x2a3   : > { %v1097_v52 = vsub.f32 1.5, %v1096_v42  ;;  %v1354_v42 = vand.u32 2147483648, %v4133_v40 }
 0x2a4   : > { %v3305_v53 = vpop.eup %3304  ;;  %v4140_v56 = vadd.f32 1e-05, %v1036_v47  ;;  %v4143_v57 = vsub.f32 %v4045_v6, %v962_v48  ;;  %v4146_v58 = vadd.f32 %v4094_v55, %v1245_v51  ;;  %vm1353_vm6 = vcmp.eq.f32.partialorder %v1352_v41, 8.507059e+37 }
 0x2a5   : > { %v1098_v60 = vmul.f32 %v3301_v31, %v1097_v52  ;;  %v1104_v61 = vmul.f32 %v3305_v53, %v4119_v32  ;;  %vm1110_vm13 = vweird.f32 %v3305_v53 }
 0x2a6   : > { %v3307_v62 = vpop.eup %3306  ;;  %3310 = vrsqrt.f32 %v4140_v56  ;;  %v994_v0 = vmul.f32 %v4143_v57, %v4143_v57  ;;  %v2971_v2 = vmul.f32 -1.442695, %v4146_v58  ;;  %vm1111_vm15 = vmor %vm1109_vm14, %vm1110_vm13  ;;  %vm1119_vm5 = vweird.f32 %v4140_v56 }
 0x2a7   : > { %v4154_v3 = vpop.eup %3308  ;;  %v1102_v6 = vsel %vm1101_vm12, %v3301_v31, %v1098_v60  ;;  %v1105_v49 = vmul.f32 %v3305_v53, %v1104_v61  ;;  %v4156_v10 = vadd.f32 1.0, %v3307_v62 }
 0x2a8   : > { %1021 = vadd.xlane.f32.xlu0 %v994_v0  ;;  %v1344_v5 = vmul.f32 %v4154_v3, %v4133_v40  ;;  %v1226_v11 = vmul.f32 %v1102_v6, %v4032_v63  ;;  %3312 = vpow2.f32 %v2971_v2  ;;  %vm1349_vm1 = vweird.f32 %v4154_v3 }
 0x2a9   : > { %v1106_v12 = vmul.f32 0.5, %v1105_v49  ;;  %v4161_v15 = vpop.xlane.xlu0 %1011  ;;  %v937_v18 = vpop.xlane.xlu2 %936  ;;  %3314 = vrcp.f32 %v4156_v10  ;;  %v1367_v47 = vand.u32 2147483647, %v4156_v10  ;;  %vm4192_vm3 = vmor %vm1348_vm0, %vm1349_vm1  ;;  %v1369_v51 = vand.u32 2147483648, %v4156_v10 }
 0x2aa   : > { %v963_v59 = vmul.f32 %v4006_v45, %v937_v18  ;;  %v1345_v20 = vsub.f32 1.0, %v1344_v5  ;;  %v1246_v22 = vmul.f32 %v4088_v50, %v1226_v11  ;;  %v1355_v40 = vor.u32 1.1754944e-38, %v1354_v42 }
 0x2ab   : > { %v1107_v21 = vsub.f32 1.5, %v1106_v12  ;;  %vm1363_vm8 = vweird.f32 %v4156_v10  ;;  %vm1368_vm10 = vcmp.eq.f32.partialorder %v1367_v47, 8.507059e+37  ;;  %v1370_v5 = vor.u32 1.1754944e-38, %v1369_v51 }
 0x2ac   : > { %v3311_v23 = vpop.eup %3310  ;;  %v4167_v24 = vsub.f32 %v4054_v13, %v963_v59  ;;  %v1346_v63 = vmul.f32 %v4154_v3, %v1345_v20  ;;  %v4173_v27 = vadd.f32 %v4094_v55, %v1246_v22 }
 0x2ad   : > { %v1108_v25 = vmul.f32 %v3305_v53, %v1107_v21  ;;  %v1114_v26 = vmul.f32 %v3311_v23, %v4140_v56  ;;  %vm1120_vm2 = vweird.f32 %v3311_v23 }
 0x2ae   : > { %v3313_v28 = vpop.eup %3312  ;;  %v995_v29 = vmul.f32 %v4167_v24, %v4167_v24  ;;  %v2972_v35 = vmul.f32 -1.442695, %v4173_v27  ;;  %v1347_v32 = vadd.f32 %v4154_v3, %v1346_v63  ;;  %vm1121_vm7 = vmor %vm1119_vm5, %vm1120_vm2 }
 0x2af   : > { %v3315_v31 = vpop.eup %3314  ;;  %v1112_v13 = vsel %vm1111_vm15, %v3305_v53, %v1108_v25  ;;  %v1115_v34 = vmul.f32 %v3311_v23, %v1114_v26  ;;  %v4179_v36 = vadd.f32 1.0, %v3313_v28 }
 0x2b0   : > { %1023 = vadd.xlane.f32.xlu1 %v995_v29  ;;  %v1359_v37 = vmul.f32 %v3315_v31, %v4156_v10  ;;  %v1227_v38 = vmul.f32 %v1112_v13, %v4040_v4  ;;  %3316 = vpow2.f32 %v2972_v35  ;;  %v1351_v60 = vsel %vm4192_vm3, %v4154_v3, %v1347_v32 }
 0x2b1   : > { %v1116_v39 = vmul.f32 0.5, %v1115_v34  ;;  %v939_v1 = vpop.xlane.xlu0 %938  ;;  %3318 = vrcp.f32 %v4179_v36  ;;  %vm1364_vm4 = vweird.f32 %v3315_v31  ;;  %v1356_v3 = vsel %vm1353_vm6, %v1355_v40, %v1351_v60 }
 0x2b2   : > { %v964_v44 = vmul.f32 %v4006_v45, %v939_v1  ;;  %v1360_v46 = vsub.f32 1.0, %v1359_v37  ;;  %v1247_v52 = vmul.f32 %v4088_v50, %v1227_v38  ;;  %vm1365_vm9 = vmor %vm1363_vm8, %vm1364_vm4  ;;  %v1384_v32 = vand.u32 2147483648, %v4179_v36 }
 0x2b3   : > { %v1117_v48 = vsub.f32 1.5, %v1116_v39  ;;  %vm1378_vm12 = vweird.f32 %v4179_v36  ;;  %v1382_v37 = vand.u32 2147483647, %v4179_v36 }
 0x2b4   : > { %v4199_v53 = vsub.f32 %v4061_v16, %v964_v44  ;;  %v1361_v61 = vmul.f32 %v3315_v31, %v1360_v46  ;;  %v4209_v16 = vadd.f32 %v4094_v55, %v1247_v52  ;;  %v1385_v46 = vor.u32 1.1754944e-38, %v1384_v32 }
 0x2b5   : > { %v1118_v62 = vmul.f32 %v3311_v23, %v1117_v48  ;;  %vm1383_vm15 = vcmp.eq.f32.partialorder %v1382_v37, 8.507059e+37 }
 0x2b6   : > { %v996_v0 = vmul.f32 %v4199_v53, %v4199_v53  ;;  %v1362_v2 = vadd.f32 %v3315_v31, %v1361_v61  ;;  %v3317_v6 = vpop.eup %3316  ;;  %v2973_v59 = vmul.f32 -1.442695, %v4209_v16 }
 0x2b7   : > { %v1122_v49 = vsel %vm1121_vm7, %v3311_v23, %v1118_v62  ;;  %v3319_v11 = vpop.eup %3318  ;;  %v1330_v12 = vadd.f32 1.0, %v3317_v6  ;;  %v1583_v23 = vmul.f32 %v1356_v3, %v4105_v8 }
 0x2b8   : > { %1025 = vadd.xlane.f32.xlu2 %v996_v0  ;;  %v1366_v56 = vsel %vm1365_vm9, %v3315_v31, %v1362_v2  ;;  %v1228_v18 = vmul.f32 %v1122_v49, %v4048_v9  ;;  %v1374_v10 = vmul.f32 %v3319_v11, %v4179_v36  ;;  %vm1379_vm11 = vweird.f32 %v3319_v11 }
 0x2b9   : > { %v941_v20 = vpop.xlane.xlu0 %940  ;;  %v1371_v21 = vsel %vm1368_vm10, %v1370_v5, %v1366_v56  ;;  %3320 = vrcp.f32 %v1330_v12  ;;  %vm1380_vm13 = vmor %vm1378_vm12, %vm1379_vm11  ;;  %v1397_v1 = vand.u32 2147483647, %v1330_v12  ;;  %v1399_v41 = vand.u32 2147483648, %v1330_v12 }
 0x2ba   : > { %v965_v22 = vmul.f32 %v4006_v45, %v941_v20  ;;  %v1584_v63 = vmul.f32 %v1371_v21, %v4125_v33  ;;  %v1375_v25 = vsub.f32 1.0, %v1374_v10  ;;  %v1248_v9 = vmul.f32 %v4088_v50, %v1228_v18 }
 0x2bb   : > { %3322 = vpow2.f32 %v2973_v59  ;;  %vm1393_vm0 = vweird.f32 %v1330_v12  ;;  %v1400_v51 = vor.u32 1.1754944e-38, %v1399_v41  ;;  %vm1398_vm2 = vcmp.eq.f32.partialorder %v1397_v1, 8.507059e+37 }
 0x2bc   : > { %v4218_v26 = vsub.f32 %v4064_v17, %v965_v22  ;;  %v1599_v28 = vpack.c.bf16 %v1584_v63, %v1583_v23  ;;  %v1376_v29 = vmul.f32 %v3319_v11, %v1375_v25  ;;  %v4224_v13 = vadd.f32 %v4094_v55, %v1248_v9 }
 0x2bd   : > { %v1037_v2 = vmul.f32 %v4161_v15, %v4006_v45 }
 0x2be   : > { %1680 = vmatmul.bf16.vlgmr.msrb.gmra.mxu3 %v1599_v28  ;;  %v997_v31 = vmul.f32 %v4218_v26, %v4218_v26  ;;  %v2974_v33 = vmul.f32 -1.442695, %v4224_v13  ;;  %v1377_v34 = vadd.f32 %v3319_v11, %v1376_v29 }
 0x2bf   : > { %v3321_v8 = vpop.eup %3320 }
 0x2c0   : > { %1027 = vadd.xlane.f32.xlu0 %v997_v31  ;;  %v1389_v17 = vmul.f32 %v3321_v8, %v1330_v12  ;;  %3324 = vpow2.f32 %v2974_v33  ;;  %v1381_v42 = vsel %vm1380_vm13, %v3319_v11, %v1377_v34  ;;  %vm1394_vm14 = vweird.f32 %v3321_v8 }
 0x2c1   : > { %v3323_v35 = vpop.eup %3322  ;;  %v1386_v4 = vsel %vm1383_vm15, %v1385_v46, %v1381_v42  ;;  %vm1395_vm1 = vmor %vm1393_vm0, %vm1394_vm14  ;;  %v1053_v11 = vadd.f32 1e-05, %v1037_v2 }
 0x2c2   : > { %v1390_v38 = vsub.f32 1.0, %v1389_v17  ;;  %v1331_v39 = vadd.f32 1.0, %v3323_v35  ;;  %v1585_v62 = vmul.f32 %v1386_v4, %v4146_v58 }
 0x2c3   : > { %vm1129_vm12 = vweird.f32 %v1053_v11 }
 0x2c4   : > { %v1391_v44 = vmul.f32 %v3321_v8, %v1390_v38  ;;  %3326 = vrcp.f32 %v1331_v39  ;;  %v1414_v18 = vand.u32 2147483648, %v1331_v39  ;;  %vm1408_vm4 = vweird.f32 %v1331_v39 }
 0x2c5   : > { %v1412_v59 = vand.u32 2147483647, %v1331_v39 }
 0x2c6   : > { %v1392_v47 = vadd.f32 %v3321_v8, %v1391_v44  ;;  %v3325_v48 = vpop.eup %3324  ;;  %v1415_v10 = vor.u32 1.1754944e-38, %v1414_v18 }
 0x2c7   : > { %v1332_v36 = vadd.f32 1.0, %v3325_v48  ;;  %vm1413_vm7 = vcmp.eq.f32.partialorder %v1412_v59, 8.507059e+37 }
 0x2c8   : > { %v1396_v52 = vsel %vm1395_vm1, %v3321_v8, %v1392_v47 }
 0x2c9   : > { %v1401_v60 = vsel %vm1398_vm2, %v1400_v51, %v1396_v52  ;;  %3328 = vrcp.f32 %v1332_v36  ;;  %v1427_v15 = vand.u32 2147483647, %v1332_v36  ;;  %vm1423_vm8 = vweird.f32 %v1332_v36 }
 0x2ca   : > { %v3327_v61 = vpop.eup %3326  ;;  %v1586_v40 = vmul.f32 %v1401_v60, %v4173_v27  ;;  %3330 = vrsqrt.f32 %v1053_v11  ;;  %v1429_v27 = vand.u32 2147483648, %v1332_v36 }
 0x2cb   : > { %v1404_v0 = vmul.f32 %v3327_v61, %v1331_v39  ;;  %vm1409_vm3 = vweird.f32 %v3327_v61  ;;  %vm1428_vm10 = vcmp.eq.f32.partialorder %v1427_v15, 8.507059e+37 }
 0x2cc   : > { %v1600_v6 = vpack.c.bf16 %v1586_v40, %v1585_v62  ;;  %vm1410_vm5 = vmor %vm1408_vm4, %vm1409_vm3  ;;  %v1430_v63 = vor.u32 1.1754944e-38, %v1429_v27 }
 0x2cd   : > { %v1405_v49 = vsub.f32 1.0, %v1404_v0 }
 0x2ce   : > { %1685 = vmatmul.bf16.gmra.mxu3 %v1600_v6 }
 0x2cf   : > { %v1406_v3 = vmul.f32 %v3327_v61, %v1405_v49  ;;  %v3329_v5 = vpop.eup %3328 }
 0x2d0   : > { %v1419_v12 = vmul.f32 %v3329_v5, %v1332_v36  ;;  %vm1424_vm6 = vweird.f32 %v3329_v5  ;;  %v3331_v28 = vpop.eup %3330 }
 0x2d1   : > { %v1407_v56 = vadd.f32 %v3327_v61, %v1406_v3  ;;  %vm1425_vm9 = vmor %vm1423_vm8, %vm1424_vm6  ;;  %v1124_v8 = vmul.f32 %v3331_v28, %v1053_v11  ;;  %vm1130_vm11 = vweird.f32 %v3331_v28 }
 0x2d2   : > { %v1420_v58 = vsub.f32 1.0, %v1419_v12  ;;  %vm1131_vm13 = vmor %vm1129_vm12, %vm1130_vm11 }
 0x2d3   : > { %v1411_v20 = vsel %vm1410_vm5, %v3327_v61, %v1407_v56  ;;  %v1125_v34 = vmul.f32 %v3331_v28, %v1124_v8 }
 0x2d4   : > { %v1421_v21 = vmul.f32 %v3329_v5, %v1420_v58  ;;  %v1416_v23 = vsel %vm1413_vm7, %v1415_v10, %v1411_v20 }
 0x2d5   : > { %v1587_v29 = vmul.f32 %v1416_v23, %v4209_v16  ;;  %v1126_v17 = vmul.f32 0.5, %v1125_v34 }
 0x2d6   : > { %v1422_v22 = vadd.f32 %v3329_v5, %v1421_v21 }
 0x2d7   : > { %v1127_v35 = vsub.f32 1.5, %v1126_v17 }
 0x2d8   : > { %v1426_v25 = vsel %vm1425_vm9, %v3329_v5, %v1422_v22 }
 0x2d9   : > { %v1431_v9 = vsel %vm1428_vm10, %v1430_v63, %v1426_v25  ;;  %v1128_v32 = vmul.f32 %v3331_v28, %v1127_v35 }
 0x2da   : > { %v1588_v31 = vmul.f32 %v1431_v9, %v4224_v13 }
 0x2db   : > { %v1132_v37 = vsel %vm1131_vm13, %v3331_v28, %v1128_v32 }
 0x2dc   : > { %v1601_v33 = vpack.c.bf16 %v1588_v31, %v1587_v29  ;;  %v1229_v38 = vmul.f32 %v1132_v37, %v4056_v14 }
 0x2de   : > { %1690 = vmatmul.bf16.gmra.mxu3 %v1601_v33  ;;  %v1249_v39 = vmul.f32 %v4088_v50, %v1229_v38 }
 0x2e0   : > { %v4240_v13 = vadd.f32 %v4094_v55, %v1249_v39 }
 0x2e2   : > { %v2975_v42 = vmul.f32 -1.442695, %v4240_v13 }
 0x2fb   : > { %v1014_v1 = vpop.xlane.xlu1 %1013 }
 0x2fc   : > { %v1038_v16 = vmul.f32 %v1014_v1, %v4006_v45 }
 0x2fe   : > { %v1054_v41 = vadd.f32 1e-05, %v1038_v16 }
 0x300   : > { %3332 = vrsqrt.f32 %v1054_v41  ;;  %vm1139_vm15 = vweird.f32 %v1054_v41 }
 0x301   : > { %3334 = vpow2.f32 %v2975_v42 }
 0x303   : > { %v1016_v44 = vpop.xlane.xlu1 %1015 }
 0x304   : > { %v1039_v46 = vmul.f32 %v1016_v44, %v4006_v45 }
 0x306   : > { %v3333_v47 = vpop.eup %3332  ;;  %v1055_v48 = vadd.f32 1e-05, %v1039_v46 }
 0x307   : > { %v1134_v4 = vmul.f32 %v3333_v47, %v1054_v41  ;;  %v3335_v51 = vpop.eup %3334  ;;  %vm1140_vm14 = vweird.f32 %v3333_v47 }
 0x308   : > { %3336 = vrsqrt.f32 %v1055_v48  ;;  %v4249_v49 = vadd.f32 1.0, %v3335_v51  ;;  %vm1141_vm0 = vmor %vm1139_vm15, %vm1140_vm14  ;;  %vm1149_vm2 = vweird.f32 %v1055_v48 }
 0x309   : > { %v1135_v14 = vmul.f32 %v3333_v47, %v1134_v4 }
 0x30a   : > { %vm1438_vm11 = vweird.f32 %v4249_v49 }
 0x30b   : > { %v1136_v52 = vmul.f32 0.5, %v1135_v14  ;;  %v1018_v36 = vpop.xlane.xlu2 %1017  ;;  %v943_v60 = vpop.xlane.xlu1 %942 }
 0x30c   : > { %v1040_v61 = vmul.f32 %v1018_v36, %v4006_v45  ;;  %v966_v62 = vmul.f32 %v4006_v45, %v943_v60 }
 0x30d   : > { %v1137_v40 = vsub.f32 1.5, %v1136_v52 }
 0x30e   : > { %v3337_v0 = vpop.eup %3336  ;;  %v1056_v2 = vadd.f32 1e-05, %v1040_v61  ;;  %v4247_v6 = vsub.f32 %v4112_v19, %v966_v62 }
 0x30f   : > { %v1138_v3 = vmul.f32 %v3333_v47, %v1137_v40  ;;  %v1144_v5 = vmul.f32 %v3337_v0, %v1055_v48  ;;  %vm1150_vm1 = vweird.f32 %v3337_v0 }
 0x310   : > { %3338 = vrsqrt.f32 %v1056_v2  ;;  %v998_v11 = vmul.f32 %v4247_v6, %v4247_v6  ;;  %vm1151_vm3 = vmor %vm1149_vm2, %vm1150_vm1  ;;  %vm1159_vm5 = vweird.f32 %v1056_v2 }
 0x311   : > { %v1142_v56 = vsel %vm1141_vm0, %v3333_v47, %v1138_v3  ;;  %v1145_v12 = vmul.f32 %v3337_v0, %v1144_v5  ;;  %3340 = vrcp.f32 %v4249_v49 }
 0x312   : > { %1029 = vadd.xlane.f32.xlu1 %v998_v11  ;;  %v1230_v18 = vmul.f32 %v1142_v56, %v4071_v30 }
 0x313   : > { %v1146_v59 = vmul.f32 0.5, %v1145_v12  ;;  %v1020_v19 = vpop.xlane.xlu2 %1019  ;;  %v1444_v12 = vand.u32 2147483648, %v4249_v49 }
 0x314   : > { %v1041_v58 = vmul.f32 %v1020_v19, %v4006_v45  ;;  %v1250_v27 = vmul.f32 %v4088_v50, %v1230_v18 }
 0x315   : > { %v1147_v20 = vsub.f32 1.5, %v1146_v59 }
 0x316   : > { %v3339_v21 = vpop.eup %3338  ;;  %v1057_v15 = vadd.f32 1e-05, %v1041_v58  ;;  %v4258_v10 = vadd.f32 %v4094_v55, %v1250_v27 }
 0x317   : > { %v1148_v22 = vmul.f32 %v3337_v0, %v1147_v20  ;;  %v1154_v23 = vmul.f32 %v3339_v21, %v1056_v2  ;;  %v4260_v63 = vpop.eup %3340  ;;  %vm1160_vm4 = vweird.f32 %v3339_v21 }
 0x318   : > { %3342 = vrsqrt.f32 %v1057_v15  ;;  %v2976_v30 = vmul.f32 -1.442695, %v4258_v10  ;;  %v1434_v8 = vmul.f32 %v4260_v63, %v4249_v49  ;;  %vm1161_vm6 = vmor %vm1159_vm5, %vm1160_vm4  ;;  %vm1439_vm8 = vweird.f32 %v4260_v63 }
 0x319   : > { %v1152_v25 = vsel %vm1151_vm3, %v3337_v0, %v1148_v22  ;;  %v1155_v28 = vmul.f32 %v3339_v21, %v1154_v23  ;;  %vm1169_vm9 = vweird.f32 %v1057_v15  ;;  %vm4299_vm12 = vmor %vm1438_vm11, %vm1439_vm8 }
 0x31a   : > { %3344 = vpow2.f32 %v2976_v30  ;;  %v1231_v9 = vmul.f32 %v1152_v25, %v4080_v43  ;;  %v1435_v39 = vsub.f32 1.0, %v1434_v8  ;;  %v1445_v25 = vor.u32 1.1754944e-38, %v1444_v12 }
 0x31b   : > { %v1156_v29 = vmul.f32 0.5, %v1155_v28  ;;  %v1022_v31 = vpop.xlane.xlu0 %1021 }
 0x31c   : > { %v1042_v33 = vmul.f32 %v1022_v31, %v4006_v45  ;;  %v1251_v34 = vmul.f32 %v4088_v50, %v1231_v9  ;;  %v1436_v4 = vmul.f32 %v4260_v63, %v1435_v39 }
 0x31d   : > { %v1157_v17 = vsub.f32 1.5, %v1156_v29 }
 0x31e   : > { %v3343_v35 = vpop.eup %3342  ;;  %v4268_v32 = vadd.f32 1e-05, %v1042_v33  ;;  %v4271_v37 = vadd.f32 %v4094_v55, %v1251_v34  ;;  %v1437_v0 = vadd.f32 %v4260_v63, %v1436_v4 }
 0x31f   : > { %v1158_v38 = vmul.f32 %v3339_v21, %v1157_v17  ;;  %v1164_v43 = vmul.f32 %v3343_v35, %v1057_v15  ;;  %vm1170_vm7 = vweird.f32 %v3343_v35 }
 0x320   : > { %v3345_v1 = vpop.eup %3344  ;;  %3346 = vrsqrt.f32 %v4268_v32  ;;  %v2977_v16 = vmul.f32 -1.442695, %v4271_v37  ;;  %vm1171_vm10 = vmor %vm1169_vm9, %vm1170_vm7  ;;  %vm1179_vm0 = vweird.f32 %v4268_v32 }
 0x321   : > { %v1162_v41 = vsel %vm1161_vm6, %v3339_v21, %v1158_v38  ;;  %v1165_v42 = vmul.f32 %v3343_v35, %v1164_v43  ;;  %v4275_v44 = vadd.f32 1.0, %v3345_v1  ;;  %v1441_v21 = vsel %vm4299_vm12, %v4260_v63, %v1437_v0 }
 0x322   : > { %v1232_v46 = vmul.f32 %v1162_v41, %v4102_v7  ;;  %3348 = vpow2.f32 %v2977_v16  ;;  %v1442_v7 = vand.u32 2147483647, %v4249_v49 }
 0x323   : > { %v1166_v47 = vmul.f32 0.5, %v1165_v42  ;;  %v1024_v48 = vpop.xlane.xlu1 %1023  ;;  %3350 = vrcp.f32 %v4275_v44  ;;  %v1459_v23 = vand.u32 2147483648, %v4275_v44  ;;  %v1457_v28 = vand.u32 2147483647, %v4275_v44 }
 0x324   : > { %v1043_v14 = vmul.f32 %v1024_v48, %v4006_v45  ;;  %v1252_v51 = vmul.f32 %v4088_v50, %v1232_v46  ;;  %vm4308_vm13 = vcmp.eq.f32.partialorder %v1442_v7, 8.507059e+37  ;;  %vm1453_vm2 = vweird.f32 %v4275_v44 }
 0x325   : > { %v1167_v52 = vsub.f32 1.5, %v1166_v47  ;;  %v1446_v34 = vsel %vm4308_vm13, %v1445_v25, %v1441_v21  ;;  %v1460_v38 = vor.u32 1.1754944e-38, %v1459_v23  ;;  %vm1458_vm4 = vcmp.eq.f32.partialorder %v1457_v28, 8.507059e+37 }
 0x326   : > { %v3347_v36 = vpop.eup %3346  ;;  %v4282_v60 = vadd.f32 1e-05, %v1043_v14  ;;  %v4287_v61 = vadd.f32 %v4094_v55, %v1252_v51  ;;  %v1589_v48 = vmul.f32 %v1446_v34, %v4240_v13 }
 0x327   : > { %v1168_v62 = vmul.f32 %v3343_v35, %v1167_v52  ;;  %v1174_v40 = vmul.f32 %v3347_v36, %v4268_v32  ;;  %vm1180_vm14 = vweird.f32 %v3347_v36 }
 0x328   : > { %v3349_v2 = vpop.eup %3348  ;;  %3352 = vrsqrt.f32 %v4282_v60  ;;  %v2978_v3 = vmul.f32 -1.442695, %v4287_v61  ;;  %vm1181_vm1 = vmor %vm1179_vm0, %vm1180_vm14  ;;  %vm1189_vm6 = vweird.f32 %v4282_v60 }
 0x329   : > { %v3351_v5 = vpop.eup %3350  ;;  %v1172_v11 = vsel %vm1171_vm10, %v3343_v35, %v1168_v62  ;;  %v1175_v56 = vmul.f32 %v3347_v36, %v1174_v40  ;;  %v4295_v18 = vadd.f32 1.0, %v3349_v2 }
 0x32a   : > { %v1449_v19 = vmul.f32 %v3351_v5, %v4275_v44  ;;  %3354 = vpow2.f32 %v2978_v3  ;;  %v1233_v58 = vmul.f32 %v1172_v11, %v4122_v54  ;;  %vm1454_vm15 = vweird.f32 %v3351_v5 }
 0x32b   : > { %v1176_v27 = vmul.f32 0.5, %v1175_v56  ;;  %v1026_v20 = vpop.xlane.xlu2 %1025  ;;  %3356 = vrcp.f32 %v4295_v18  ;;  %vm1455_vm3 = vmor %vm1453_vm2, %vm1454_vm15  ;;  %vm1468_vm8 = vweird.f32 %v4295_v18  ;;  %v1472_v12 = vand.u32 2147483647, %v4295_v18 }
 0x32c   : > { %v1044_v15 = vmul.f32 %v1026_v20, %v4006_v45  ;;  %v1450_v22 = vsub.f32 1.0, %v1449_v19  ;;  %v1253_v30 = vmul.f32 %v4088_v50, %v1233_v58  ;;  %v1474_v59 = vand.u32 2147483648, %v4295_v18 }
 0x32d   : > { %v1177_v54 = vsub.f32 1.5, %v1176_v27  ;;  %vm1473_vm15 = vcmp.eq.f32.partialorder %v1472_v12, 8.507059e+37 }
 0x32e   : > { %v3353_v9 = vpop.eup %3352  ;;  %v4317_v63 = vadd.f32 1e-05, %v1044_v15  ;;  %v1451_v29 = vmul.f32 %v3351_v5, %v1450_v22  ;;  %v4320_v31 = vadd.f32 %v4094_v55, %v1253_v30 }
 0x32f   : > { %v1178_v8 = vmul.f32 %v3347_v36, %v1177_v54  ;;  %v1184_v33 = vmul.f32 %v3353_v9, %v4282_v60  ;;  %vm1190_vm5 = vweird.f32 %v3353_v9 }
 0x330   : > { %v3355_v17 = vpop.eup %3354  ;;  %3358 = vrsqrt.f32 %v4317_v63  ;;  %v1452_v35 = vadd.f32 %v3351_v5, %v1451_v29  ;;  %v2979_v16 = vmul.f32 -1.442695, %v4320_v31  ;;  %vm1191_vm7 = vmor %vm1189_vm6, %vm1190_vm5  ;;  %vm1199_vm13 = vweird.f32 %v4317_v63 }
 0x331   : > { %v4328_v43 = vpop.eup %3356  ;;  %v1182_v39 = vsel %vm1181_vm1, %v3347_v36, %v1178_v8  ;;  %v1185_v1 = vmul.f32 %v3353_v9, %v1184_v33  ;;  %v4331_v32 = vadd.f32 1.0, %v3355_v17 }
 0x332   : > { %v1456_v41 = vsel %vm1455_vm3, %v3351_v5, %v1452_v35  ;;  %v1464_v42 = vmul.f32 %v4328_v43, %v4295_v18  ;;  %v1234_v46 = vmul.f32 %v1182_v39, %v4143_v57  ;;  %vm1469_vm9 = vweird.f32 %v4328_v43 }
 0x333   : > { %v1186_v47 = vmul.f32 0.5, %v1185_v1  ;;  %v1461_v44 = vsel %vm1458_vm4, %v1460_v38, %v1456_v41  ;;  %3360 = vrcp.f32 %v4331_v32  ;;  %v1487_v27 = vand.u32 2147483647, %v4331_v32  ;;  %vm4360_vm11 = vmor %vm1468_vm8, %vm1469_vm9 }
 0x334   : > { %v1590_v4 = vmul.f32 %v1461_v44, %v4258_v10  ;;  %v1465_v14 = vsub.f32 1.0, %v1464_v42  ;;  %v1254_v52 = vmul.f32 %v4088_v50, %v1234_v46  ;;  %3362 = vpow2.f32 %v2979_v16 }
 0x335   : > { %v1187_v51 = vsub.f32 1.5, %v1186_v47  ;;  %v1489_v15 = vand.u32 2147483648, %v4331_v32  ;;  %v1475_v18 = vor.u32 1.1754944e-38, %v1474_v59  ;;  %vm1483_vm0 = vweird.f32 %v4331_v32 }
 0x336   : > { %v3359_v36 = vpop.eup %3358  ;;  %v1602_v7 = vpack.c.bf16 %v1590_v4, %v1589_v48  ;;  %v1466_v62 = vmul.f32 %v4328_v43, %v1465_v14  ;;  %v4345_v13 = vadd.f32 %v4094_v55, %v1254_v52  ;;  %vm1488_vm2 = vcmp.eq.f32.partialorder %v1487_v27, 8.507059e+37  ;;  %v3487_v52 = vld [vmem:[%s4870_s6] ss:$0 sm:$0xff] }
 0x337   : > { %v1188_v40 = vmul.f32 %v3353_v9, %v1187_v51  ;;  %v1194_v57 = vmul.f32 %v3359_v36, %v4317_v63  ;;  %vm1200_vm10 = vweird.f32 %v3359_v36  ;;  %v1490_v8 = vor.u32 1.1754944e-38, %v1489_v15 }
 0x338   : > { %1695 = vmatmul.bf16.gmra.mxu3 %v1602_v7  ;;  %v1467_v3 = vadd.f32 %v4328_v43, %v1466_v62  ;;  %v2980_v60 = vmul.f32 -1.442695, %v4345_v13  ;;  %vm1201_vm14 = vmor %vm1199_vm13, %vm1200_vm10 }
 0x339   : > { %v3361_v10 = vpop.eup %3360  ;;  %v1192_v0 = vsel %vm1191_vm7, %v3353_v9, %v1188_v40  ;;  %v1195_v2 = vmul.f32 %v3359_v36, %v1194_v57 }
 0x33a   : > { %v1479_v5 = vmul.f32 %v3361_v10, %v4331_v32  ;;  %v3363_v11 = vpop.eup %3362  ;;  %v1235_v19 = vmul.f32 %v1192_v0, %v4167_v24  ;;  %3364 = vpow2.f32 %v2980_v60  ;;  %v1471_v24 = vsel %vm4360_vm11, %v4328_v43, %v1467_v3 }
 0x33b   : > { %v1196_v56 = vmul.f32 0.5, %v1195_v2  ;;  %v4356_v20 = vadd.f32 1.0, %v3363_v11  ;;  %vm1484_vm12 = vweird.f32 %v3361_v10  ;;  %v1476_v29 = vsel %vm1473_vm15, %v1475_v18, %v1471_v24 }
 0x33c   : > { %v1480_v58 = vsub.f32 1.0, %v1479_v5  ;;  %v1255_v22 = vmul.f32 %v4088_v50, %v1235_v19  ;;  %vm1485_vm1 = vmor %vm1483_vm0, %vm1484_vm12  ;;  %v1591_v39 = vmul.f32 %v1476_v29, %v4271_v37  ;;  %v1028_v19 = vpop.xlane.xlu0 %1027 }
 0x33d   : > { %v1197_v21 = vsub.f32 1.5, %v1196_v56  ;;  %3366 = vrcp.f32 %v4356_v20  ;;  %v1504_v14 = vand.u32 2147483648, %v4356_v20  ;;  %vm1498_vm4 = vweird.f32 %v4356_v20 }
 0x33e   : > { %v1481_v23 = vmul.f32 %v3361_v10, %v1480_v58  ;;  %v4373_v25 = vadd.f32 %v4094_v55, %v1255_v22  ;;  %v1045_v15 = vmul.f32 %v1028_v19, %v4006_v45 }
 0x33f   : > { %v1198_v30 = vmul.f32 %v3359_v36, %v1197_v21 }
 0x340   : > { %v1482_v54 = vadd.f32 %v3361_v10, %v1481_v23  ;;  %v3365_v33 = vpop.eup %3364  ;;  %v2981_v17 = vmul.f32 -1.442695, %v4373_v25 }
 0x341   : > { %v1202_v28 = vsel %vm1201_vm14, %v3359_v36, %v1198_v30  ;;  %v4375_v9 = vpop.f32.mrf.mxu3  ;;  %v1338_v38 = vadd.f32 1.0, %v3365_v33 }
 0x342   : > { %1721 = vadd.xlane.f32.xlu2 %v4375_v9  ;;  %v1486_v34 = vsel %vm1485_vm1, %v3361_v10, %v1482_v54  ;;  %v1236_v63 = vmul.f32 %v1202_v28, %v4199_v53  ;;  %3368 = vpow2.f32 %v2981_v17  ;;  %v1505_v10 = vor.u32 1.1754944e-38, %v1504_v14 }
 0x343   : > { %v1491_v35 = vsel %vm1488_vm2, %v1490_v8, %v1486_v34  ;;  %v3367_v43 = vpop.eup %3366  ;;  %3370 = vrcp.f32 %v1338_v38  ;;  %v1519_v36 = vand.u32 2147483648, %v1338_v38  ;;  %v1517_v40 = vand.u32 2147483647, %v1338_v38 }
 0x344   : > { %v1592_v1 = vmul.f32 %v1491_v35, %v4287_v61  ;;  %v1256_v32 = vmul.f32 %v4088_v50, %v1236_v63  ;;  %v1494_v16 = vmul.f32 %v3367_v43, %v4356_v20  ;;  %vm1499_vm3 = vweird.f32 %v3367_v43 }
 0x345   : > { %vm4394_vm5 = vmor %vm1498_vm4, %vm1499_vm3  ;;  %vm1513_vm8 = vweird.f32 %v1338_v38  ;;  %v1520_v11 = vor.u32 1.1754944e-38, %v1519_v36  ;;  %vm1518_vm10 = vcmp.eq.f32.partialorder %v1517_v40, 8.507059e+37  ;;  %v1061_v54 = vadd.f32 1e-05, %v1045_v15 }
 0x346   : > { %v1603_v41 = vpack.c.bf16 %v1592_v1, %v1591_v39  ;;  %v1495_v42 = vsub.f32 1.0, %v1494_v16  ;;  %v4385_v46 = vadd.f32 %v4094_v55, %v1256_v32  ;;  %v1502_v55 = vand.u32 2147483647, %v4356_v20 }
 0x347   : > { %vm1209_vm4 = vweird.f32 %v1061_v54 }
 0x348   : > { %1700 = vmatmul.bf16.gmra.mxu3 %v1603_v41  ;;  %v1496_v47 = vmul.f32 %v3367_v43, %v1495_v42  ;;  %v2982_v44 = vmul.f32 -1.442695, %v4385_v46  ;;  %v3369_v37 = vpop.eup %3368  ;;  %vm1503_vm7 = vcmp.eq.f32.partialorder %v1502_v55, 8.507059e+37 }
 0x349   : > { %v4387_v53 = vpop.f32.mrf.mxu3  ;;  %v3371_v61 = vpop.eup %3370  ;;  %v1339_v50 = vadd.f32 1.0, %v3369_v37 }
 0x34a   : > { %1723 = vadd.xlane.f32.xlu0 %v4387_v53  ;;  %3372 = vpow2.f32 %v2982_v44  ;;  %v1497_v48 = vadd.f32 %v3367_v43, %v1496_v47  ;;  %v1509_v4 = vmul.f32 %v3371_v61, %v1338_v38  ;;  %vm1514_vm6 = vweird.f32 %v3371_v61 }
 0x34b   : > { %3374 = vrcp.f32 %v1339_v50  ;;  %vm1515_vm9 = vmor %vm1513_vm8, %vm1514_vm6  ;;  %v1534_v18 = vand.u32 2147483648, %v1339_v50  ;;  %vm1528_vm12 = vweird.f32 %v1339_v50 }
 0x34c   : > { %v1510_v51 = vsub.f32 1.0, %v1509_v4  ;;  %v1501_v7 = vsel %vm4394_vm5, %v3367_v43, %v1497_v48 }
 0x34d   : > { %v1506_v60 = vsel %vm1503_vm7, %v1505_v10, %v1501_v7  ;;  %v1535_v34 = vor.u32 1.1754944e-38, %v1534_v18 }
 0x34e   : > { %v1511_v62 = vmul.f32 %v3371_v61, %v1510_v51  ;;  %v1593_v58 = vmul.f32 %v1506_v60, %v4320_v31  ;;  %v1532_v31 = vand.u32 2147483647, %v1339_v50 }
 0x350   : > { %v3373_v57 = vpop.eup %3372  ;;  %v1512_v2 = vadd.f32 %v3371_v61, %v1511_v62  ;;  %vm1533_vm15 = vcmp.eq.f32.partialorder %v1532_v31, 8.507059e+37 }
 0x351   : > { %v4400_v0 = vpop.f32.mrf.mxu3  ;;  %v1340_v3 = vadd.f32 1.0, %v3373_v57  ;;  %v3375_v5 = vpop.eup %3374 }
 0x352   : > { %1725 = vadd.xlane.f32.xlu1 %v4400_v0  ;;  %v1516_v56 = vsel %vm1515_vm9, %v3371_v61, %v1512_v2  ;;  %v1524_v12 = vmul.f32 %v3375_v5, %v1339_v50  ;;  %vm1529_vm11 = vweird.f32 %v3375_v5 }
 0x353   : > { %3376 = vrcp.f32 %v1340_v3  ;;  %v1521_v59 = vsel %vm1518_vm10, %v1520_v11, %v1516_v56  ;;  %vm1530_vm13 = vmor %vm1528_vm12, %vm1529_vm11  ;;  %v1547_v33 = vand.u32 2147483647, %v1340_v3  ;;  %vm1543_vm0 = vweird.f32 %v1340_v3 }
 0x354   : > { %v1594_v27 = vmul.f32 %v1521_v59, %v4345_v13  ;;  %v1525_v20 = vsub.f32 1.0, %v1524_v12  ;;  %v1549_v13 = vand.u32 2147483648, %v1340_v3  ;;  %3378 = vrsqrt.f32 %v1061_v54 }
 0x355   : > { %vm1548_vm2 = vcmp.eq.f32.partialorder %v1547_v33, 8.507059e+37 }
 0x356   : > { %v1604_v21 = vpack.c.bf16 %v1594_v27, %v1593_v58  ;;  %v1526_v49 = vmul.f32 %v3375_v5, %v1525_v20  ;;  %v1550_v35 = vor.u32 1.1754944e-38, %v1549_v13 }
 0x358   : > { %1705 = vmatmul.bf16.gmra.mxu3 %v1604_v21  ;;  %v1527_v23 = vadd.f32 %v3375_v5, %v1526_v49 }
 0x359   : > { %v3377_v22 = vpop.eup %3376  ;;  %v4406_v24 = vpop.f32.mrf.mxu3 }
 0x35a   : > { %1727 = vadd.xlane.f32.xlu2 %v4406_v24  ;;  %v1539_v30 = vmul.f32 %v3377_v22, %v1340_v3  ;;  %v1531_v29 = vsel %vm1530_vm13, %v3375_v5, %v1527_v23  ;;  %vm1544_vm14 = vweird.f32 %v3377_v22  ;;  %v3379_v16 = vpop.eup %3378 }
 0x35b   : > { %v1536_v17 = vsel %vm1533_vm15, %v1535_v34, %v1531_v29  ;;  %vm1545_vm1 = vmor %vm1543_vm0, %vm1544_vm14  ;;  %v1204_v42 = vmul.f32 %v3379_v16, %v1061_v54  ;;  %vm1210_vm3 = vweird.f32 %v3379_v16 }
 0x35c   : > { %v1540_v28 = vsub.f32 1.0, %v1539_v30  ;;  %v1595_v1 = vmul.f32 %v1536_v17, %v4373_v25  ;;  %vm1211_vm5 = vmor %vm1209_vm4, %vm1210_vm3 }
 0x35d   : > { %v1205_v44 = vmul.f32 %v3379_v16, %v1204_v42 }
 0x35e   : > { %v1541_v8 = vmul.f32 %v3377_v22, %v1540_v28 }
 0x35f   : > { %v1206_v37 = vmul.f32 0.5, %v1205_v44 }
 0x360   : > { %v1542_v63 = vadd.f32 %v3377_v22, %v1541_v8 }
 0x361   : > { %v4409_v38 = vpop.f32.mrf.mxu3  ;;  %v1207_v61 = vsub.f32 1.5, %v1206_v37 }
 0x362   : > { %v1546_v43 = vsel %vm1545_vm1, %v3377_v22, %v1542_v63  ;;  %1729 = vadd.xlane.f32.xlu0 %v4409_v38 }
 0x363   : > { %v1551_v39 = vsel %vm1548_vm2, %v1550_v35, %v1546_v43  ;;  %v1208_v50 = vmul.f32 %v3379_v16, %v1207_v61 }
 0x364   : > { %v1596_v32 = vmul.f32 %v1551_v39, %v4385_v46  ;;  %v3486_v46 = vld [vmem:[%s4869_s5] ss:$0 sm:$0xff] }
 0x365   : > { %v1212_v48 = vsel %vm1211_vm5, %v3379_v16, %v1208_v50 }
 0x366   : > { %v1605_v41 = vpack.c.bf16 %v1596_v32, %v1595_v1  ;;  %v1237_v25 = vmul.f32 %v1212_v48, %v4218_v26 }
 0x368   : > { %1710 = vmatmul.bf16.gmra.mxu3 %v1605_v41  ;;  %v1257_v14 = vmul.f32 %v3486_v46, %v1237_v25 }
 0x369   : > { %v4414_v47 = vpop.f32.mrf.mxu3 }
 0x36a   : > { %1731 = vadd.xlane.f32.xlu1 %v4414_v47  ;;  %v1277_v36 = vadd.f32 %v3487_v52, %v1257_v14 }
 0x36c   : > { %v2983_v7 = vmul.f32 -1.442695, %v1277_v36 }
 0x385   : > { %v1030_v4 = vpop.xlane.xlu1 %1029 }
 0x386   : > { %v1046_v55 = vmul.f32 %v1030_v4, %v4006_v45 }
 0x388   : > { %v1062_v51 = vadd.f32 1e-05, %v1046_v55 }
 0x38a   : > { %3380 = vrsqrt.f32 %v1062_v51  ;;  %vm1219_vm7 = vweird.f32 %v1062_v51 }
 0x38b   : > { %3382 = vpow2.f32 %v2983_v7 }
 0x390   : > { %v3381_v62 = vpop.eup %3380 }
 0x391   : > { %v1214_v40 = vmul.f32 %v3381_v62, %v1062_v51  ;;  %v3383_v10 = vpop.eup %3382  ;;  %vm1220_vm6 = vweird.f32 %v3381_v62 }
 0x392   : > { %vm1221_vm8 = vmor %vm1219_vm7, %vm1220_vm6  ;;  %v1341_v5 = vadd.f32 1.0, %v3383_v10 }
 0x393   : > { %v1215_v26 = vmul.f32 %v3381_v62, %v1214_v40 }
 0x394   : > { %3384 = vrcp.f32 %v1341_v5  ;;  %vm1558_vm10 = vweird.f32 %v1341_v5  ;;  %v1564_v18 = vand.u32 2147483648, %v1341_v5  ;;  %v1562_v31 = vand.u32 2147483647, %v1341_v5 }
 0x395   : > { %v1216_v57 = vmul.f32 0.5, %v1215_v26 }
 0x396   : > { %v1565_v63 = vor.u32 1.1754944e-38, %v1564_v18  ;;  %vm1563_vm13 = vcmp.eq.f32.partialorder %v1562_v31, 8.507059e+37 }
 0x397   : > { %v1217_v2 = vsub.f32 1.5, %v1216_v57 }
 0x399   : > { %v1218_v3 = vmul.f32 %v3381_v62, %v1217_v2 }
 0x39a   : > { %v3385_v19 = vpop.eup %3384 }
 0x39b   : > { %v1222_v60 = vsel %vm1221_vm8, %v3381_v62, %v1218_v3  ;;  %v1554_v58 = vmul.f32 %v3385_v19, %v1341_v5  ;;  %vm1559_vm9 = vweird.f32 %v3385_v19 }
 0x39c   : > { %v1238_v11 = vmul.f32 %v1222_v60, %v4247_v6  ;;  %vm4427_vm11 = vmor %vm1558_vm10, %vm1559_vm9 }
 0x39d   : > { %v1555_v21 = vsub.f32 1.0, %v1554_v58 }
 0x39e   : > { %v1258_v56 = vmul.f32 %v3486_v46, %v1238_v11 }
 0x39f   : > { %v1556_v49 = vmul.f32 %v3385_v19, %v1555_v21  ;;  %v3170_v21 = vld [vmem:[#allocation11 + $0x74] sm:$0xf0] }
 0x3a0   : > { %v1278_v12 = vadd.f32 %v3487_v52, %v1258_v56 }
 0x3a1   : > { %v1557_v22 = vadd.f32 %v3385_v19, %v1556_v49  ;;  %v3169_v49 = vld [vmem:[#allocation11 + $0x74] sm:$0xf] }
 0x3a2   : > { %v2984_v59 = vmul.f32 -1.442695, %v1278_v12 }
 0x3a3   : > { %v1561_v13 = vsel %vm4427_vm11, %v3385_v19, %v1557_v22 }
 0x3a4   : > { %3386 = vpow2.f32 %v2984_v59  ;;  %v1566_v39 = vsel %vm1563_vm13, %v1565_v63, %v1561_v13  ;;  %v3085_v13 = vld [vmem:[#allocation11 + $0x60] sm:$0xf] }
 0x3a5   : > { %v1597_v42 = vmul.f32 %v1566_v39, %v1277_v36 }
 0x3aa   : > { %v3387_v27 = vpop.eup %3386 }
 0x3ab   : > { %v1342_v20 = vadd.f32 1.0, %v3387_v27 }
 0x3ad   : > { %3388 = vrcp.f32 %v1342_v20  ;;  %v1579_v29 = vand.u32 2147483648, %v1342_v20  ;;  %v1577_v34 = vand.u32 2147483647, %v1342_v20  ;;  %vm1573_vm14 = vweird.f32 %v1342_v20 }
 0x3af   : > { %v1580_v1 = vor.u32 1.1754944e-38, %v1579_v29  ;;  %vm1578_vm0 = vcmp.eq.f32.partialorder %v1577_v34, 8.507059e+37  ;;  %v3168_v29 = vld [vmem:[#allocation11 + $0x64] sm:$0xf0] }
 0x3b0   : > { %v3086_v63 = vor.u32 %v3168_v29, %v3085_v13 }
 0x3b3   : > { %v3389_v15 = vpop.eup %3388 }
 0x3b4   : > { %v1569_v23 = vmul.f32 %v3389_v15, %v1342_v20  ;;  %vm1574_vm12 = vweird.f32 %v3389_v15  ;;  %v3093_v20 = vld [vmem:[#allocation11 + $0x70] sm:$0xf] }
 0x3b5   : > { %v1722_v30 = vpop.xlane.xlu2 %1721  ;;  %vm1575_vm15 = vmor %vm1573_vm14, %vm1574_vm12 }
 0x3b6   : > { %v1753_v6 = vmul.f32 %v1722_v30, %v4006_v45  ;;  %v1570_v28 = vsub.f32 1.0, %v1569_v23  ;;  %v3094_v23 = vor.u32 %v3170_v21, %v3093_v20  ;;  %v3095_v30 = vld [vmem:[#allocation11 + $0x78] sm:$0xf0]  ;;  %v3061_v20 = vld [vmem:[#allocation11 + $0x30] sm:$0xf] }
 0x3b7   : > { %v3098_v18 = vor.u32 %v3169_v49, %v3095_v30  ;;  %v3162_v21 = vld [vmem:[#allocation11 + $0x34] sm:$0xf0] }
 0x3b8   : > { %v4434_v8 = vsub.f32 %v4375_v9, %v1753_v6  ;;  %v1571_v33 = vmul.f32 %v3389_v15, %v1570_v28  ;;  %2507 = vmatpush.bf16.msrb.mxu0 %v3094_v23  ;;  %v3161_v23 = vld [vmem:[#allocation11 + $0x34] sm:$0xf] }
 0x3b9   : > { %2556 = vmatpush.bf16.msrb.mxu1 %v3098_v18 }
 0x3ba   : > { %v1785_v17 = vmul.f32 %v4434_v8, %v4434_v8  ;;  %v1572_v35 = vadd.f32 %v3389_v15, %v1571_v33  ;;  %v3167_v33 = vld [vmem:[#allocation11 + $0x64] sm:$0xf] }
 0x3bb   : > { %v1696_v43 = vpop.f32.mrf.mxu3 }
 0x3bc   : > { %1801 = vadd.xlane.f32.xlu2 %v1785_v17  ;;  %1733 = vadd.xlane.f32.xlu1 %v1696_v43  ;;  %v1576_v32 = vsel %vm1575_vm15, %v3389_v15, %v1572_v35  ;;  %v3087_v17 = vld [vmem:[#allocation11 + $0x68] sm:$0xf0] }
 0x3bd   : > { %v1724_v9 = vpop.xlane.xlu0 %1723  ;;  %v1581_v16 = vsel %vm1578_vm0, %v1580_v1, %v1576_v32  ;;  %v3090_v39 = vor.u32 %v3167_v33, %v3087_v17  ;;  %2508 = vmatpush.bf16.msrb.mxu0 %v3086_v63 }
 0x3be   : > { %v1754_v41 = vmul.f32 %v1724_v9, %v4006_v45  ;;  %v1598_v44 = vmul.f32 %v1581_v16, %v1278_v12  ;;  %v3077_v9 = vld [vmem:[#allocation11 + $0x50] sm:$0xf]  ;;  %v3166_v16 = vld [vmem:[#allocation11 + $0x54] sm:$0xf0] }
 0x3bf   : > { %2557 = vmatpush.bf16.msrb.mxu1 %v3090_v39  ;;  %v3160_v39 = vld [vmem:[#allocation11 + $0x24] sm:$0xf0] }
 0x3c0   : > { %v4440_v37 = vsub.f32 %v4387_v53, %v1754_v41  ;;  %v1606_v61 = vpack.c.bf16 %v1598_v44, %v1597_v42  ;;  %v3078_v44 = vor.u32 %v3166_v16, %v3077_v9  ;;  %v3159_v9 = vld [vmem:[#allocation11 + $0x24] sm:$0xf]  ;;  %v3055_v16 = vld [vmem:[#allocation11 + $0x28] sm:$0xf0] }
 0x3c2   : > { %1715 = vmatmul.bf16.gmra.mxu3 %v1606_v61  ;;  %v1786_v50 = vmul.f32 %v4440_v37, %v4440_v37  ;;  %v3165_v61 = vld [vmem:[#allocation11 + $0x54] sm:$0xf]  ;;  %2509 = vmatpush.bf16.msrb.mxu0 %v3078_v44 }
 0x3c3   : > { %v1698_v48 = vpop.f32.mrf.mxu3 }
 0x3c4   : > { %1735 = vadd.xlane.f32.xlu2 %v1698_v48  ;;  %1803 = vadd.xlane.f32.xlu0 %v1786_v50  ;;  %v3079_v50 = vld [vmem:[#allocation11 + $0x58] sm:$0xf0] }
 0x3c5   : > { %v1726_v25 = vpop.xlane.xlu1 %1725 }
 0x3c6   : > { %v1755_v4 = vmul.f32 %v1726_v25, %v4006_v45 }
 0x3c8   : > { %v4446_v46 = vsub.f32 %v4400_v0, %v1755_v4  ;;  %v3082_v4 = vor.u32 %v3165_v61, %v3079_v50  ;;  %v3058_v50 = vor.u32 %v3159_v9, %v3055_v16 }
 0x3ca   : > { %v1787_v53 = vmul.f32 %v4446_v46, %v4446_v46  ;;  %2558 = vmatpush.bf16.msrb.mxu1 %v3082_v4  ;;  %v3157_v4 = vld [vmem:[#allocation11 + $0x14] sm:$0xf] }
 0x3cb   : > { %v4448_v14 = vpop.f32.mrf.mxu3 }
 0x3cc   : > { %1737 = vadd.xlane.f32.xlu2 %v4448_v14  ;;  %1805 = vadd.xlane.f32.xlu0 %v1787_v53 }
 0x3cd   : > { %v1728_v55 = vpop.xlane.xlu2 %1727 }
 0x3ce   : > { %v1756_v51 = vmul.f32 %v1728_v55, %v4006_v45 }
 0x3d0   : > { %v4455_v52 = vsub.f32 %v4406_v24, %v1756_v51  ;;  %v4509_v51 = vld [vmem:[%s4869_s5 + $0x1] ss:$0 sm:$0xff] }
 0x3d2   : > { %v1788_v0 = vmul.f32 %v4455_v52, %v4455_v52 }
 0x3d3   : > { %v4457_v36 = vpop.f32.mrf.mxu3 }
 0x3d4   : > { %1807 = vadd.xlane.f32.xlu1 %v1788_v0  ;;  %1739 = vadd.xlane.f32.xlu0 %v4457_v36 }
 0x3d5   : > { %v1730_v7 = vpop.xlane.xlu0 %1729 }
 0x3d6   : > { %v1757_v62 = vmul.f32 %v1730_v7, %v4006_v45 }
 0x3d8   : > { %v4464_v40 = vsub.f32 %v4409_v38, %v1757_v62 }
 0x3da   : > { %v1789_v26 = vmul.f32 %v4464_v40, %v4464_v40 }
 0x3db   : > { %v4468_v57 = vpop.f32.mrf.mxu3 }
 0x3dc   : > { %1809 = vadd.xlane.f32.xlu1 %v1789_v26  ;;  %1741 = vadd.xlane.f32.xlu0 %v4468_v57  ;;  %v3069_v26 = vld [vmem:[#allocation11 + $0x40] sm:$0xf] }
 0x3dd   : > { %v1732_v24 = vpop.xlane.xlu1 %1731 }
 0x3de   : > { %v1758_v10 = vmul.f32 %v1732_v24, %v4006_v45  ;;  %v3164_v24 = vld [vmem:[#allocation11 + $0x44] sm:$0xf0] }
 0x3e0   : > { %v4473_v2 = vsub.f32 %v4414_v47, %v1758_v10  ;;  %v3070_v10 = vor.u32 %v3164_v24, %v3069_v26  ;;  %v3037_v26 = vld [vmem:[#allocation11] sm:$0xf] }
 0x3e2   : > { %v1790_v3 = vmul.f32 %v4473_v2, %v4473_v2  ;;  %2510 = vmatpush.bf16.msrb.mxu0 %v3070_v10 }
 0x3e3   : > { %v4477_v5 = vpop.f32.mrf.mxu3 }
 0x3e4   : > { %1743 = vadd.xlane.f32.xlu1 %v4477_v5  ;;  %1811 = vadd.xlane.f32.xlu2 %v1790_v3  ;;  %v3163_v3 = vld [vmem:[#allocation11 + $0x44] sm:$0xf] }
 0x3eb   : > { %v4480_v38 = vpop.f32.mrf.mxu3 }
 0x3ec   : > { %1745 = vadd.xlane.f32.xlu1 %v4480_v38 }
 0x3f3   : > { %v4498_v35 = vpop.f32.mrf.mxu3 }
 0x42f   : > { %v1802_v60 = vpop.xlane.xlu2 %1801  ;;  %v1734_v11 = vpop.xlane.xlu1 %1733 }
 0x430   : > { %v1833_v56 = vmul.f32 %v1802_v60, %v4006_v45  ;;  %v1759_v12 = vmul.f32 %v1734_v11, %v4006_v45  ;;  %v3071_v60 = vld [vmem:[#allocation11 + $0x48] sm:$0xf0] }
 0x432   : > { %v1849_v47 = vadd.f32 1e-05, %v1833_v56  ;;  %v4485_v59 = vsub.f32 %v1696_v43, %v1759_v12 }
 0x434   : > { %3390 = vrsqrt.f32 %v1849_v47  ;;  %v1791_v19 = vmul.f32 %v4485_v59, %v4485_v59  ;;  %vm1871_vm2 = vweird.f32 %v1849_v47 }
 0x436   : > { %1813 = vadd.xlane.f32.xlu2 %v1791_v19  ;;  %v3074_v19 = vor.u32 %v3163_v3, %v3071_v60  ;;  %v3156_v3 = vld [vmem:[#allocation11 + $0x4] sm:$0xf0]  ;;  %v3155_v60 = vld [vmem:[#allocation11 + $0x4] sm:$0xf] }
 0x437   : > { %v1736_v58 = vpop.xlane.xlu2 %1735  ;;  %v1804_v27 = vpop.xlane.xlu0 %1803 }
 0x438   : > { %v1760_v15 = vmul.f32 %v1736_v58, %v4006_v45  ;;  %v1834_v22 = vmul.f32 %v1804_v27, %v4006_v45  ;;  %v4524_v58 = vld [vmem:[%s4870_s6 + $0x1] ss:$0 sm:$0xff]  ;;  %2559 = vmatpush.bf16.msrb.mxu1 %v3074_v19 }
 0x43a   : > { %v3391_v6 = vpop.eup %3390  ;;  %v4491_v54 = vsub.f32 %v1698_v48, %v1760_v15  ;;  %v4493_v31 = vadd.f32 1e-05, %v1834_v22  ;;  %v3062_v22 = vor.u32 %v3162_v21, %v3061_v20  ;;  %v3038_v20 = vor.u32 %v3156_v3, %v3037_v26 }
 0x43b   : > { %v1866_v28 = vmul.f32 %v3391_v6, %v1849_v47  ;;  %vm1872_vm1 = vweird.f32 %v3391_v6 }
 0x43c   : > { %3392 = vrsqrt.f32 %v4493_v31  ;;  %v1792_v34 = vmul.f32 %v4491_v54, %v4491_v54  ;;  %vm1873_vm3 = vmor %vm1871_vm2, %vm1872_vm1  ;;  %vm1881_vm5 = vweird.f32 %v4493_v31  ;;  %2511 = vmatpush.bf16.msrb.mxu0 %v3062_v22 }
 0x43d   : > { %v1867_v43 = vmul.f32 %v3391_v6, %v1866_v28 }
 0x43e   : > { %1815 = vadd.xlane.f32.xlu0 %v1792_v34  ;;  %1747 = vadd.xlane.f32.xlu2 %v4498_v35 }
 0x43f   : > { %v1868_v1 = vmul.f32 0.5, %v1867_v43  ;;  %v1738_v32 = vpop.xlane.xlu2 %1737  ;;  %v1806_v42 = vpop.xlane.xlu0 %1805  ;;  %v3053_v43 = vld [vmem:[#allocation11 + $0x20] sm:$0xf] }
 0x440   : > { %v1761_v41 = vmul.f32 %v1738_v32, %v4006_v45  ;;  %v1835_v25 = vmul.f32 %v1806_v42, %v4006_v45  ;;  %v3054_v32 = vor.u32 %v3160_v39, %v3053_v43 }
 0x441   : > { %v1869_v48 = vsub.f32 1.5, %v1868_v1 }
 0x442   : > { %v3393_v53 = vpop.eup %3392  ;;  %v4504_v55 = vsub.f32 %v4448_v14, %v1761_v41  ;;  %v4512_v62 = vadd.f32 1e-05, %v1835_v25  ;;  %2512 = vmatpush.bf16.msrb.mxu0 %v3054_v32  ;;  %v3158_v25 = vld [vmem:[#allocation11 + $0x14] sm:$0xf0] }
 0x443   : > { %v1870_v0 = vmul.f32 %v3391_v6, %v1869_v48  ;;  %v1876_v7 = vmul.f32 %v3393_v53, %v4493_v31  ;;  %vm1882_vm4 = vweird.f32 %v3393_v53  ;;  %v3045_v48 = vld [vmem:[#allocation11 + $0x10] sm:$0xf] }
 0x444   : > { %v1793_v14 = vmul.f32 %v4504_v55, %v4504_v55  ;;  %3394 = vrsqrt.f32 %v4512_v62  ;;  %vm1883_vm6 = vmor %vm1881_vm5, %vm1882_vm4  ;;  %vm1891_vm8 = vweird.f32 %v4512_v62 }
 0x445   : > { %v1874_v11 = vsel %vm1873_vm3, %v3391_v6, %v1870_v0  ;;  %v1877_v56 = vmul.f32 %v3393_v53, %v1876_v7  ;;  %v4517_v12 = vpop.f32.mrf.mxu3  ;;  %v3046_v0 = vor.u32 %v3158_v25, %v3045_v48  ;;  %v3047_v7 = vld [vmem:[#allocation11 + $0x18] sm:$0xf0] }
 0x446   : > { %v2025_v47 = vmul.f32 %v1874_v11, %v4434_v8  ;;  %1817 = vadd.xlane.f32.xlu0 %v1793_v14  ;;  %1749 = vadd.xlane.f32.xlu2 %v4517_v12  ;;  %v3063_v8 = vld [vmem:[#allocation11 + $0x38] sm:$0xf0]  ;;  %v3050_v10 = vor.u32 %v3157_v4, %v3047_v7  ;;  %v3039_v11 = vld [vmem:[#allocation11 + $0x8] sm:$0xf0] }
 0x447   : > { %v1878_v27 = vmul.f32 0.5, %v1877_v56  ;;  %v1740_v49 = vpop.xlane.xlu0 %1739  ;;  %v1808_v15 = vpop.xlane.xlu1 %1807  ;;  %v3066_v13 = vor.u32 %v3161_v23, %v3063_v8  ;;  %2513 = vmatpush.bf16.msrb.mxu0 %v3046_v0  ;;  %v3042_v8 = vor.u32 %v3155_v60, %v3039_v11 }
 0x448   : > { %v2046_v30 = vmul.f32 %v4509_v51, %v2025_v47  ;;  %v1762_v6 = vmul.f32 %v1740_v49, %v4006_v45  ;;  %v1836_v28 = vmul.f32 %v1808_v15, %v4006_v45 }
 0x449   : > { %v1879_v18 = vsub.f32 1.5, %v1878_v27  ;;  %2560 = vmatpush.bf16.msrb.mxu1 %v3066_v13 }
 0x44a   : > { %v4530_v29 = vadd.f32 %v4524_v58, %v2046_v30  ;;  %v4532_v33 = vpop.eup %3394  ;;  %v4536_v63 = vsub.f32 %v4457_v36, %v1762_v6  ;;  %v4538_v17 = vadd.f32 1e-05, %v1836_v28 }
 0x44b   : > { %v1880_v34 = vmul.f32 %v3393_v53, %v1879_v18  ;;  %v1886_v1 = vmul.f32 %v4532_v33, %v4512_v62  ;;  %vm1892_vm7 = vweird.f32 %v4532_v33  ;;  %2514 = vmatpush.bf16.msrb.mxu0 %v3038_v20 }
 0x44c   : > { %v3019_v41 = vmul.f32 -1.442695, %v4530_v29  ;;  %3396 = vrsqrt.f32 %v4538_v17  ;;  %v1794_v42 = vmul.f32 %v4536_v63, %v4536_v63  ;;  %vm1893_vm9 = vmor %vm1891_vm8, %vm1892_vm7  ;;  %vm1901_vm11 = vweird.f32 %v4538_v17 }
 0x44d   : > { %v1884_v31 = vsel %vm1883_vm6, %v3393_v53, %v1880_v34  ;;  %v4545_v36 = vpop.f32.mrf.mxu3  ;;  %v1887_v61 = vmul.f32 %v4532_v33, %v1886_v1  ;;  %2561 = vmatpush.bf16.msrb.mxu1 %v3058_v50 }
 0x44e   : > { %v2026_v44 = vmul.f32 %v1884_v31, %v4440_v37  ;;  %1751 = vadd.xlane.f32.xlu0 %v4545_v36  ;;  %3398 = vpow2.f32 %v3019_v41  ;;  %1819 = vadd.xlane.f32.xlu1 %v1794_v42 }
 0x44f   : > { %v1888_v53 = vmul.f32 0.5, %v1887_v61  ;;  %v1742_v14 = vpop.xlane.xlu0 %1741  ;;  %v1810_v37 = vpop.xlane.xlu1 %1809 }
 0x450   : > { %v2047_v24 = vmul.f32 %v4509_v51, %v2026_v44  ;;  %v1763_v47 = vmul.f32 %v1742_v14, %v4006_v45  ;;  %v1837_v19 = vmul.f32 %v1810_v37, %v4006_v45 }
 0x451   : > { %v1889_v56 = vsub.f32 1.5, %v1888_v53  ;;  %2562 = vmatpush.bf16.msrb.mxu1 %v3050_v10 }
 0x452   : > { %v3397_v27 = vpop.eup %3396  ;;  %v4558_v21 = vadd.f32 %v4524_v58, %v2047_v24  ;;  %v4563_v23 = vsub.f32 %v4468_v57, %v1763_v47  ;;  %v1853_v30 = vadd.f32 1e-05, %v1837_v19 }
 0x453   : > { %v1890_v15 = vmul.f32 %v4532_v33, %v1889_v56  ;;  %v1896_v22 = vmul.f32 %v3397_v27, %v4538_v17  ;;  %vm1902_vm10 = vweird.f32 %v3397_v27 }
 0x454   : > { %v3399_v49 = vpop.eup %3398  ;;  %v3020_v18 = vmul.f32 -1.442695, %v4558_v21  ;;  %v1795_v13 = vmul.f32 %v4563_v23, %v4563_v23  ;;  %3400 = vrsqrt.f32 %v1853_v30  ;;  %vm1903_vm12 = vmor %vm1901_vm11, %vm1902_vm10  ;;  %vm1911_vm14 = vweird.f32 %v1853_v30 }
 0x455   : > { %v4566_v62 = vadd.f32 1.0, %v3399_v49  ;;  %v1894_v6 = vsel %vm1893_vm9, %v4532_v33, %v1890_v15  ;;  %v1897_v28 = vmul.f32 %v3397_v27, %v1896_v22  ;;  %2563 = vmatpush.bf16.msrb.mxu1 %v3042_v8 }
 0x456   : > { %1821 = vadd.xlane.f32.xlu1 %v1795_v13  ;;  %3402 = vpow2.f32 %v3020_v18  ;;  %v2027_v57 = vmul.f32 %v1894_v6, %v4446_v46 }
 0x457   : > { %v1898_v34 = vmul.f32 0.5, %v1897_v28  ;;  %v1812_v43 = vpop.xlane.xlu2 %1811  ;;  %v1744_v39 = vpop.xlane.xlu1 %1743  ;;  %3404 = vrcp.f32 %v4566_v62  ;;  %vm2152_vm0 = vweird.f32 %v4566_v62  ;;  %v2158_v18 = vand.u32 2147483648, %v4566_v62 }
 0x458   : > { %v1838_v33 = vmul.f32 %v1812_v43, %v4006_v45  ;;  %v1764_v32 = vmul.f32 %v1744_v39, %v4006_v45  ;;  %v2048_v9 = vmul.f32 %v4509_v51, %v2027_v57  ;;  %v2156_v28 = vand.u32 2147483647, %v4566_v62 }
 0x459   : > { %v1899_v1 = vsub.f32 1.5, %v1898_v34 }
 0x45a   : > { %v4577_v41 = vadd.f32 1e-05, %v1838_v33  ;;  %v4580_v31 = vsub.f32 %v4477_v5, %v1764_v32  ;;  %v3401_v46 = vpop.eup %3400  ;;  %v4583_v42 = vadd.f32 %v4524_v58, %v2048_v9  ;;  %vm2157_vm7 = vcmp.eq.f32.partialorder %v2156_v28, 8.507059e+37 }
 0x45b   : > { %v1900_v16 = vmul.f32 %v3397_v27, %v1899_v1  ;;  %v1906_v50 = vmul.f32 %v3401_v46, %v1853_v30  ;;  %vm1912_vm13 = vweird.f32 %v3401_v46 }
 0x45c   : > { %v3403_v44 = vpop.eup %3402  ;;  %3406 = vrsqrt.f32 %v4577_v41  ;;  %v1796_v17 = vmul.f32 %v4580_v31, %v4580_v31  ;;  %v3021_v0 = vmul.f32 -1.442695, %v4583_v42  ;;  %vm1913_vm15 = vmor %vm1911_vm14, %vm1912_vm13  ;;  %vm1921_vm5 = vweird.f32 %v4577_v41 }
 0x45d   : > { %v1904_v61 = vsel %vm1903_vm12, %v3397_v27, %v1900_v16  ;;  %v4586_v48 = vpop.eup %3404  ;;  %v4590_v25 = vadd.f32 1.0, %v3403_v44  ;;  %v1907_v4 = vmul.f32 %v3401_v46, %v1906_v50 }
 0x45e   : > { %v2028_v5 = vmul.f32 %v1904_v61, %v4455_v52  ;;  %v2148_v53 = vmul.f32 %v4586_v48, %v4566_v62  ;;  %1823 = vadd.xlane.f32.xlu2 %v1796_v17  ;;  %vm2153_vm1 = vweird.f32 %v4586_v48  ;;  %v2159_v62 = vor.u32 1.1754944e-38, %v2158_v18 }
 0x45f   : > { %v1746_v7 = vpop.xlane.xlu1 %1745  ;;  %3408 = vrcp.f32 %v4590_v25  ;;  %v1908_v26 = vmul.f32 0.5, %v1907_v4  ;;  %v2171_v34 = vand.u32 2147483647, %v4590_v25  ;;  %vm4622_vm3 = vmor %vm2152_vm0, %vm2153_vm1  ;;  %v2173_v1 = vand.u32 2147483648, %v4590_v25 }
 0x460   : > { %v1765_v24 = vmul.f32 %v1746_v7, %v4006_v45  ;;  %v2149_v14 = vsub.f32 1.0, %v2148_v53  ;;  %v2049_v37 = vmul.f32 %v4509_v51, %v2028_v5  ;;  %3410 = vpow2.f32 %v3021_v0 }
 0x461   : > { %v1909_v52 = vsub.f32 1.5, %v1908_v26  ;;  %vm2167_vm8 = vweird.f32 %v4590_v25  ;;  %vm2172_vm10 = vcmp.eq.f32.partialorder %v2171_v34, 8.507059e+37 }
 0x462   : > { %v3407_v10 = vpop.eup %3406  ;;  %v4600_v3 = vsub.f32 %v4480_v38, %v1765_v24  ;;  %v2150_v60 = vmul.f32 %v4586_v48, %v2149_v14  ;;  %v4604_v11 = vadd.f32 %v4524_v58, %v2049_v37 }
 0x463   : > { %v1916_v56 = vmul.f32 %v3407_v10, %v4577_v41  ;;  %v1910_v47 = vmul.f32 %v3401_v46, %v1909_v52  ;;  %vm1922_vm2 = vweird.f32 %v3407_v10 }
 0x464   : > { %v1797_v19 = vmul.f32 %v4600_v3, %v4600_v3  ;;  %v3022_v27 = vmul.f32 -1.442695, %v4604_v11  ;;  %v2151_v15 = vadd.f32 %v4586_v48, %v2150_v60  ;;  %vm1923_vm6 = vmor %vm1921_vm5, %vm1922_vm2 }
 0x465   : > { %v3409_v20 = vpop.eup %3408  ;;  %v1917_v49 = vmul.f32 %v3407_v10, %v1916_v56  ;;  %v1914_v38 = vsel %vm1913_vm15, %v3401_v46, %v1910_v47 }
 0x466   : > { %1825 = vadd.xlane.f32.xlu0 %v1797_v19  ;;  %v2163_v22 = vmul.f32 %v3409_v20, %v4590_v25  ;;  %v3411_v8 = vpop.eup %3410  ;;  %3412 = vpow2.f32 %v3022_v27  ;;  %v2029_v6 = vmul.f32 %v1914_v38, %v4464_v40  ;;  %v2155_v40 = vsel %vm4622_vm3, %v4586_v48, %v2151_v15 }
 0x467   : > { %v1918_v30 = vmul.f32 0.5, %v1917_v49  ;;  %v4618_v57 = vadd.f32 1.0, %v3411_v8  ;;  %vm2168_vm4 = vweird.f32 %v3409_v20  ;;  %v2160_v50 = vsel %vm2157_vm7, %v2159_v62, %v2155_v40 }
 0x468   : > { %v2164_v13 = vsub.f32 1.0, %v2163_v22  ;;  %v2050_v33 = vmul.f32 %v4509_v51, %v2029_v6  ;;  %vm2169_vm9 = vmor %vm2167_vm8, %vm2168_vm4  ;;  %v2174_v48 = vor.u32 1.1754944e-38, %v2173_v1  ;;  %v2387_v7 = vmul.f32 %v2160_v50, %v4530_v29 }
 0x469   : > { %v1919_v43 = vsub.f32 1.5, %v1918_v30  ;;  %3414 = vrcp.f32 %v4618_v57  ;;  %v2188_v19 = vand.u32 2147483648, %v4618_v57  ;;  %vm2182_vm12 = vweird.f32 %v4618_v57 }
 0x46a   : > { %v2165_v32 = vmul.f32 %v3409_v20, %v2164_v13  ;;  %v4634_v16 = vadd.f32 %v4524_v58, %v2050_v33  ;;  %v2186_v27 = vand.u32 2147483647, %v4618_v57 }
 0x46b   : > { %v1920_v9 = vmul.f32 %v3407_v10, %v1919_v43  ;;  %v2189_v8 = vor.u32 1.1754944e-38, %v2188_v19 }
 0x46c   : > { %v2166_v46 = vadd.f32 %v3409_v20, %v2165_v32  ;;  %v3413_v44 = vpop.eup %3412  ;;  %v3023_v17 = vmul.f32 -1.442695, %v4634_v16  ;;  %vm2187_vm15 = vcmp.eq.f32.partialorder %v2186_v27, 8.507059e+37 }
 0x46d   : > { %v1924_v61 = vsel %vm1923_vm6, %v3407_v10, %v1920_v9  ;;  %v2134_v4 = vadd.f32 1.0, %v3413_v44 }
 0x46e   : > { %v2170_v5 = vsel %vm2169_vm9, %v3409_v20, %v2166_v46  ;;  %v2030_v41 = vmul.f32 %v1924_v61, %v4473_v2  ;;  %3416 = vpow2.f32 %v3023_v17 }
 0x46f   : > { %v2175_v53 = vsel %vm2172_vm10, %v2174_v48, %v2170_v5  ;;  %v3415_v0 = vpop.eup %3414  ;;  %3418 = vrcp.f32 %v2134_v4  ;;  %v2203_v49 = vand.u32 2147483648, %v2134_v4  ;;  %v2201_v22 = vand.u32 2147483647, %v2134_v4 }
 0x470   : > { %v2388_v26 = vmul.f32 %v2175_v53, %v4558_v21  ;;  %v2178_v25 = vmul.f32 %v3415_v0, %v4618_v57  ;;  %v2051_v24 = vmul.f32 %v4509_v51, %v2030_v41  ;;  %vm2183_vm11 = vweird.f32 %v3415_v0 }
 0x471   : > { %vm2184_vm13 = vmor %vm2182_vm12, %vm2183_vm11  ;;  %vm2197_vm0 = vweird.f32 %v2134_v4  ;;  %v2204_v13 = vor.u32 1.1754944e-38, %v2203_v49  ;;  %vm2202_vm2 = vcmp.eq.f32.partialorder %v2201_v22, 8.507059e+37 }
 0x472   : > { %v2403_v14 = vpack.c.bf16 %v2388_v26, %v2387_v7  ;;  %v2179_v37 = vsub.f32 1.0, %v2178_v25  ;;  %v4644_v10 = vadd.f32 %v4524_v58, %v2051_v24 }
 0x474   : > { %2515 = vmatmul.bf16.vlgmr.msrb.gmra.mxu0 %v2403_v14  ;;  %2564 = vmatmul.bf16.vlgmr.msrb.gmra.mxu1 %v2403_v14  ;;  %v3417_v2 = vpop.eup %3416  ;;  %v2180_v52 = vmul.f32 %v3415_v0, %v2179_v37  ;;  %v3024_v60 = vmul.f32 -1.442695, %v4644_v10 }
 0x475   : > { %v3419_v56 = vpop.eup %3418  ;;  %v2135_v29 = vadd.f32 1.0, %v3417_v2 }
 0x476   : > { %v2181_v47 = vadd.f32 %v3415_v0, %v2180_v52  ;;  %v2193_v21 = vmul.f32 %v3419_v56, %v2134_v4  ;;  %3420 = vpow2.f32 %v3024_v60  ;;  %vm2198_vm14 = vweird.f32 %v3419_v56 }
 0x477   : > { %3422 = vrcp.f32 %v2135_v29  ;;  %vm2199_vm1 = vmor %vm2197_vm0, %vm2198_vm14  ;;  %v2218_v61 = vand.u32 2147483648, %v2135_v29  ;;  %vm2212_vm4 = vweird.f32 %v2135_v29  ;;  %v2216_v50 = vand.u32 2147483647, %v2135_v29 }
 0x478   : > { %v2194_v20 = vsub.f32 1.0, %v2193_v21  ;;  %v2185_v38 = vsel %vm2184_vm13, %v3415_v0, %v2181_v47 }
 0x479   : > { %v2190_v28 = vsel %vm2187_vm15, %v2189_v8, %v2185_v38  ;;  %vm2217_vm7 = vcmp.eq.f32.partialorder %v2216_v50, 8.507059e+37 }
 0x47a   : > { %v2195_v15 = vmul.f32 %v3419_v56, %v2194_v20  ;;  %v2389_v1 = vmul.f32 %v2190_v28, %v4583_v42 }
 0x47c   : > { %v3421_v30 = vpop.eup %3420  ;;  %v2196_v18 = vadd.f32 %v3419_v56, %v2195_v15 }
 0x47d   : > { %v3423_v6 = vpop.eup %3422  ;;  %v2136_v34 = vadd.f32 1.0, %v3421_v30 }
 0x47e   : > { %v2200_v43 = vsel %vm2199_vm1, %v3419_v56, %v2196_v18  ;;  %v2208_v57 = vmul.f32 %v3423_v6, %v2135_v29  ;;  %vm2213_vm3 = vweird.f32 %v3423_v6 }
 0x47f   : > { %v2205_v39 = vsel %vm2202_vm2, %v2204_v13, %v2200_v43  ;;  %3424 = vrcp.f32 %v2136_v34  ;;  %vm2214_vm5 = vmor %vm2212_vm4, %vm2213_vm3  ;;  %v2233_v17 = vand.u32 2147483648, %v2136_v34  ;;  %v2231_v42 = vand.u32 2147483647, %v2136_v34 }
 0x480   : > { %v2390_v33 = vmul.f32 %v2205_v39, %v4604_v11  ;;  %v2209_v40 = vsub.f32 1.0, %v2208_v57  ;;  %v2219_v11 = vor.u32 1.1754944e-38, %v2218_v61  ;;  %vm2227_vm8 = vweird.f32 %v2136_v34 }
 0x481   : > { %v2234_v0 = vor.u32 1.1754944e-38, %v2233_v17  ;;  %vm2232_vm10 = vcmp.eq.f32.partialorder %v2231_v42, 8.507059e+37 }
 0x482   : > { %v2404_v32 = vpack.c.bf16 %v2390_v33, %v2389_v1  ;;  %v2210_v9 = vmul.f32 %v3423_v6, %v2209_v40 }
 0x484   : > { %2520 = vmatmul.bf16.gmra.mxu0 %v2404_v32  ;;  %2569 = vmatmul.bf16.gmra.mxu1 %v2404_v32  ;;  %v2211_v46 = vadd.f32 %v3423_v6, %v2210_v9 }
 0x485   : > { %v3425_v62 = vpop.eup %3424 }
 0x486   : > { %v2223_v44 = vmul.f32 %v3425_v62, %v2136_v34  ;;  %v2215_v5 = vsel %vm2214_vm5, %v3423_v6, %v2211_v46  ;;  %vm2228_vm6 = vweird.f32 %v3425_v62 }
 0x487   : > { %v2220_v53 = vsel %vm2217_vm7, %v2219_v11, %v2215_v5  ;;  %vm2229_vm9 = vmor %vm2227_vm8, %vm2228_vm6 }
 0x488   : > { %v2224_v48 = vsub.f32 1.0, %v2223_v44  ;;  %v2391_v25 = vmul.f32 %v2220_v53, %v4634_v16 }
 0x48a   : > { %v2225_v4 = vmul.f32 %v3425_v62, %v2224_v48 }
 0x48c   : > { %v2226_v41 = vadd.f32 %v3425_v62, %v2225_v4 }
 0x48e   : > { %v2230_v7 = vsel %vm2229_vm9, %v3425_v62, %v2226_v41 }
 0x48f   : > { %v2235_v26 = vsel %vm2232_vm10, %v2234_v0, %v2230_v7 }
 0x490   : > { %v2392_v24 = vmul.f32 %v2235_v26, %v4644_v10 }
 0x492   : > { %v2405_v14 = vpack.c.bf16 %v2392_v24, %v2391_v25 }
 0x494   : > { %2525 = vmatmul.bf16.gmra.mxu0 %v2405_v14  ;;  %2574 = vmatmul.bf16.gmra.mxu1 %v2405_v14 }
 0x4a9   : > { %v1814_v37 = vpop.xlane.xlu2 %1813 }
 0x4aa   : > { %v1839_v2 = vmul.f32 %v1814_v37, %v4006_v45 }
 0x4ac   : > { %v1855_v52 = vadd.f32 1e-05, %v1839_v2 }
 0x4ae   : > { %3426 = vrsqrt.f32 %v1855_v52  ;;  %vm1931_vm12 = vweird.f32 %v1855_v52 }
 0x4b1   : > { %v1816_v60 = vpop.xlane.xlu0 %1815  ;;  %v1748_v56 = vpop.xlane.xlu2 %1747 }
 0x4b2   : > { %v1840_v29 = vmul.f32 %v1816_v60, %v4006_v45  ;;  %v1766_v47 = vmul.f32 %v1748_v56, %v4006_v45 }
 0x4b4   : > { %v3427_v21 = vpop.eup %3426  ;;  %v1856_v19 = vadd.f32 1e-05, %v1840_v29  ;;  %v4658_v16 = vsub.f32 %v4498_v35, %v1766_v47 }
 0x4b5   : > { %v1926_v10 = vmul.f32 %v3427_v21, %v1855_v52  ;;  %vm1932_vm11 = vweird.f32 %v3427_v21 }
 0x4b6   : > { %3428 = vrsqrt.f32 %v1856_v19  ;;  %v1798_v27 = vmul.f32 %v4658_v16, %v4658_v16  ;;  %vm1933_vm13 = vmor %vm1931_vm12, %vm1932_vm11  ;;  %vm1941_vm15 = vweird.f32 %v1856_v19 }
 0x4b7   : > { %v1927_v20 = vmul.f32 %v3427_v21, %v1926_v10 }
 0x4b8   : > { %1827 = vadd.xlane.f32.xlu1 %v1798_v27 }
 0x4b9   : > { %v1928_v49 = vmul.f32 0.5, %v1927_v20  ;;  %v1818_v38 = vpop.xlane.xlu0 %1817  ;;  %v1750_v15 = vpop.xlane.xlu2 %1749 }
 0x4ba   : > { %v1841_v22 = vmul.f32 %v1818_v38, %v4006_v45  ;;  %v1767_v8 = vmul.f32 %v1750_v15, %v4006_v45 }
 0x4bb   : > { %v1929_v30 = vsub.f32 1.5, %v1928_v49 }
 0x4bc   : > { %v3429_v18 = vpop.eup %3428  ;;  %v1857_v6 = vadd.f32 1e-05, %v1841_v22  ;;  %v4665_v35 = vsub.f32 %v4517_v12, %v1767_v8 }
 0x4bd   : > { %v1930_v28 = vmul.f32 %v3427_v21, %v1929_v30  ;;  %v1936_v13 = vmul.f32 %v3429_v18, %v1856_v19  ;;  %vm1942_vm14 = vweird.f32 %v3429_v18 }
 0x4be   : > { %3430 = vrsqrt.f32 %v1857_v6  ;;  %v1799_v34 = vmul.f32 %v4665_v35, %v4665_v35  ;;  %vm1943_vm0 = vmor %vm1941_vm15, %vm1942_vm14  ;;  %vm1951_vm2 = vweird.f32 %v1857_v6 }
 0x4bf   : > { %v1934_v43 = vsel %vm1933_vm13, %v3427_v21, %v1930_v28  ;;  %v1937_v57 = vmul.f32 %v3429_v18, %v1936_v13 }
 0x4c0   : > { %1829 = vadd.xlane.f32.xlu2 %v1799_v34  ;;  %v2031_v39 = vmul.f32 %v1934_v43, %v4485_v59 }
 0x4c1   : > { %v1938_v1 = vmul.f32 0.5, %v1937_v57  ;;  %v1752_v33 = vpop.xlane.xlu0 %1751  ;;  %v1820_v32 = vpop.xlane.xlu1 %1819 }
 0x4c2   : > { %v1768_v40 = vmul.f32 %v1752_v33, %v4006_v45  ;;  %v2052_v12 = vmul.f32 %v4509_v51, %v2031_v39  ;;  %v1842_v62 = vmul.f32 %v1820_v32, %v4006_v45 }
 0x4c3   : > { %v1939_v9 = vsub.f32 1.5, %v1938_v1 }
 0x4c4   : > { %v3431_v46 = vpop.eup %3430  ;;  %v4674_v44 = vsub.f32 %v4545_v36, %v1768_v40  ;;  %v4677_v61 = vadd.f32 %v4524_v58, %v2052_v12  ;;  %v1858_v48 = vadd.f32 1e-05, %v1842_v62 }
 0x4c5   : > { %v1940_v50 = vmul.f32 %v3429_v18, %v1939_v9  ;;  %v1946_v59 = vmul.f32 %v3431_v46, %v1857_v6  ;;  %vm1952_vm1 = vweird.f32 %v3431_v46 }
 0x4c6   : > { %v1800_v17 = vmul.f32 %v4674_v44, %v4674_v44  ;;  %v3025_v5 = vmul.f32 -1.442695, %v4677_v61  ;;  %3432 = vrsqrt.f32 %v1858_v48  ;;  %vm1953_vm3 = vmor %vm1951_vm2, %vm1952_vm1  ;;  %vm1961_vm5 = vweird.f32 %v1858_v48 }
 0x4c7   : > { %v1944_v4 = vsel %vm1943_vm0, %v3429_v18, %v1940_v50  ;;  %v1947_v42 = vmul.f32 %v3431_v46, %v1946_v59 }
 0x4c8   : > { %1831 = vadd.xlane.f32.xlu0 %v1800_v17  ;;  %v2032_v36 = vmul.f32 %v1944_v4, %v4491_v54  ;;  %3434 = vpow2.f32 %v3025_v5 }
 0x4c9   : > { %v1948_v11 = vmul.f32 0.5, %v1947_v42  ;;  %v1822_v0 = vpop.xlane.xlu1 %1821 }
 0x4ca   : > { %v2053_v41 = vmul.f32 %v4509_v51, %v2032_v36  ;;  %v1843_v7 = vmul.f32 %v1822_v0, %v4006_v45 }
 0x4cb   : > { %v1949_v53 = vsub.f32 1.5, %v1948_v11 }
 0x4cc   : > { %v4686_v26 = vadd.f32 %v4524_v58, %v2053_v41  ;;  %v3433_v25 = vpop.eup %3432  ;;  %v1859_v2 = vadd.f32 1e-05, %v1843_v7 }
 0x4cd   : > { %v1950_v24 = vmul.f32 %v3431_v46, %v1949_v53  ;;  %v1956_v37 = vmul.f32 %v3433_v25, %v1858_v48  ;;  %vm1962_vm4 = vweird.f32 %v3433_v25 }
 0x4ce   : > { %v3435_v14 = vpop.eup %3434  ;;  %v3026_v54 = vmul.f32 -1.442695, %v4686_v26  ;;  %3436 = vrsqrt.f32 %v1859_v2  ;;  %vm1963_vm6 = vmor %vm1961_vm5, %vm1962_vm4  ;;  %vm1971_vm8 = vweird.f32 %v1859_v2 }
 0x4cf   : > { %v1954_v52 = vsel %vm1953_vm3, %v3431_v46, %v1950_v24  ;;  %v4689_v60 = vadd.f32 1.0, %v3435_v14  ;;  %v1957_v56 = vmul.f32 %v3433_v25, %v1956_v37 }
 0x4d0   : > { %v2033_v29 = vmul.f32 %v1954_v52, %v4504_v55  ;;  %3438 = vpow2.f32 %v3026_v54 }
 0x4d1   : > { %v1958_v47 = vmul.f32 0.5, %v1957_v56  ;;  %3440 = vrcp.f32 %v4689_v60  ;;  %v1824_v10 = vpop.xlane.xlu2 %1823  ;;  %v2248_v4 = vand.u32 2147483648, %v4689_v60  ;;  %vm2242_vm11 = vweird.f32 %v4689_v60 }
 0x4d2   : > { %v2054_v21 = vmul.f32 %v4509_v51, %v2033_v29  ;;  %v1844_v20 = vmul.f32 %v1824_v10, %v4006_v45  ;;  %v2246_v36 = vand.u32 2147483647, %v4689_v60 }
 0x4d3   : > { %v1959_v19 = vsub.f32 1.5, %v1958_v47 }
 0x4d4   : > { %v4695_v27 = vadd.f32 %v4524_v58, %v2054_v21  ;;  %v3437_v49 = vpop.eup %3436  ;;  %v1860_v8 = vadd.f32 1e-05, %v1844_v20  ;;  %vm2247_vm0 = vcmp.eq.f32.partialorder %v2246_v36, 8.507059e+37 }
 0x4d5   : > { %v1960_v38 = vmul.f32 %v3433_v25, %v1959_v19  ;;  %v1966_v22 = vmul.f32 %v3437_v49, %v1859_v2  ;;  %vm1972_vm7 = vweird.f32 %v3437_v49  ;;  %v2249_v2 = vor.u32 1.1754944e-38, %v2248_v4 }
 0x4d6   : > { %v3027_v15 = vmul.f32 -1.442695, %v4695_v27  ;;  %v3439_v55 = vpop.eup %3438  ;;  %vm4707_vm9 = vmor %vm1971_vm8, %vm1972_vm7  ;;  %vm1981_vm15 = vweird.f32 %v1860_v8 }
 0x4d7   : > { %v3441_v30 = vpop.eup %3440  ;;  %v1964_v18 = vsel %vm1963_vm6, %v3433_v25, %v1960_v38  ;;  %v2138_v6 = vadd.f32 1.0, %v3439_v55  ;;  %v1967_v28 = vmul.f32 %v3437_v49, %v1966_v22 }
 0x4d8   : > { %3442 = vpow2.f32 %v3027_v15  ;;  %v2238_v13 = vmul.f32 %v3441_v30, %v4689_v60  ;;  %v2034_v57 = vmul.f32 %v1964_v18, %v4536_v63  ;;  %vm2243_vm10 = vweird.f32 %v3441_v30 }
 0x4d9   : > { %3444 = vrsqrt.f32 %v1860_v8  ;;  %v1968_v34 = vmul.f32 0.5, %v1967_v28  ;;  %vm4718_vm12 = vmor %vm2242_vm11, %vm2243_vm10  ;;  %v2263_v0 = vand.u32 2147483648, %v2138_v6  ;;  %v2261_v14 = vand.u32 2147483647, %v2138_v6  ;;  %v1826_v36 = vpop.xlane.xlu0 %1825 }
 0x4da   : > { %3446 = vrcp.f32 %v2138_v6  ;;  %v2239_v43 = vsub.f32 1.0, %v2238_v13  ;;  %v2055_v33 = vmul.f32 %v4509_v51, %v2034_v57  ;;  %vm2257_vm1 = vweird.f32 %v2138_v6 }
 0x4db   : > { %v1969_v39 = vsub.f32 1.5, %v1968_v34  ;;  %vm2262_vm4 = vcmp.eq.f32.partialorder %v2261_v14, 8.507059e+37 }
 0x4dc   : > { %v2240_v1 = vmul.f32 %v3441_v30, %v2239_v43  ;;  %v4703_v9 = vadd.f32 %v4524_v58, %v2055_v33 }
 0x4dd   : > { %v1970_v12 = vmul.f32 %v3437_v49, %v1969_v39 }
 0x4de   : > { %v3443_v40 = vpop.eup %3442  ;;  %v2241_v48 = vadd.f32 %v3441_v30, %v2240_v1  ;;  %v3028_v42 = vmul.f32 -1.442695, %v4703_v9 }
 0x4df   : > { %v3445_v32 = vpop.eup %3444  ;;  %v4705_v62 = vadd.f32 1.0, %v3443_v40  ;;  %v1974_v59 = vsel %vm4707_vm9, %v3437_v49, %v1970_v12 }
 0x4e0   : > { %v3447_v46 = vpop.eup %3446  ;;  %v1976_v63 = vmul.f32 %v3445_v32, %v1860_v8  ;;  %v2035_v7 = vmul.f32 %v1974_v59, %v4563_v23  ;;  %v2245_v25 = vsel %vm4718_vm12, %v3441_v30, %v2241_v48  ;;  %vm1982_vm14 = vweird.f32 %v3445_v32 }
 0x4e1   : > { %v2253_v17 = vmul.f32 %v3447_v46, %v2138_v6  ;;  %3448 = vrcp.f32 %v4705_v62  ;;  %vm2258_vm13 = vweird.f32 %v3447_v46  ;;  %v2250_v29 = vsel %vm2247_vm0, %v2249_v2, %v2245_v25  ;;  %vm1983_vm3 = vmor %vm1981_vm15, %vm1982_vm14 }
 0x4e2   : > { %v1977_v5 = vmul.f32 %v3445_v32, %v1976_v63  ;;  %3450 = vpow2.f32 %v3028_v42  ;;  %v2056_v54 = vmul.f32 %v4509_v51, %v2035_v7  ;;  %vm2259_vm2 = vmor %vm2257_vm1, %vm2258_vm13  ;;  %v2264_v23 = vor.u32 1.1754944e-38, %v2263_v0 }
 0x4e3   : > { %v2254_v11 = vsub.f32 1.0, %v2253_v17  ;;  %v2393_v15 = vmul.f32 %v2250_v29, %v4677_v61  ;;  %vm2272_vm6 = vweird.f32 %v4705_v62  ;;  %v2276_v1 = vand.u32 2147483647, %v4705_v62 }
 0x4e4   : > { %v1978_v41 = vmul.f32 0.5, %v1977_v5  ;;  %v4727_v47 = vadd.f32 %v4524_v58, %v2056_v54 }
 0x4e5   : > { %v2255_v24 = vmul.f32 %v3447_v46, %v2254_v11  ;;  %vm2277_vm9 = vcmp.eq.f32.partialorder %v2276_v1, 8.507059e+37 }
 0x4e6   : > { %v1979_v37 = vsub.f32 1.5, %v1978_v41  ;;  %v3029_v38 = vmul.f32 -1.442695, %v4727_v47 }
 0x4e7   : > { %v2256_v52 = vadd.f32 %v3447_v46, %v2255_v24  ;;  %v3449_v60 = vpop.eup %3448  ;;  %v1845_v24 = vmul.f32 %v1826_v36, %v4006_v45 }
 0x4e8   : > { %v1980_v56 = vmul.f32 %v3445_v32, %v1979_v37  ;;  %v2268_v19 = vmul.f32 %v3449_v60, %v4705_v62  ;;  %v3451_v10 = vpop.eup %3450  ;;  %3452 = vpow2.f32 %v3029_v38  ;;  %vm2273_vm5 = vweird.f32 %v3449_v60 }
 0x4e9   : > { %v2260_v21 = vsel %vm2259_vm2, %v3447_v46, %v2256_v52  ;;  %v2140_v22 = vadd.f32 1.0, %v3451_v10  ;;  %vm2274_vm7 = vmor %vm2272_vm6, %vm2273_vm5  ;;  %v1861_v54 = vadd.f32 1e-05, %v1845_v24 }
 0x4ea   : > { %v1984_v20 = vsel %vm1983_vm3, %v3445_v32, %v1980_v56  ;;  %v2265_v49 = vsel %vm2262_vm4, %v2264_v23, %v2260_v21  ;;  %v2269_v8 = vsub.f32 1.0, %v2268_v19 }
 0x4eb   : > { %v2394_v55 = vmul.f32 %v2265_v49, %v4686_v26  ;;  %v2036_v30 = vmul.f32 %v1984_v20, %v4580_v31  ;;  %3454 = vrcp.f32 %v2140_v22  ;;  %v2293_v40 = vand.u32 2147483648, %v2140_v22 }
 0x4ec   : > { %v2270_v28 = vmul.f32 %v3449_v60, %v2269_v8  ;;  %v2291_v46 = vand.u32 2147483647, %v2140_v22  ;;  %vm2287_vm10 = vweird.f32 %v2140_v22  ;;  %vm1991_vm6 = vweird.f32 %v1861_v54 }
 0x4ed   : > { %v2406_v18 = vpack.c.bf16 %v2394_v55, %v2393_v15  ;;  %v2057_v6 = vmul.f32 %v4509_v51, %v2036_v30 }
 0x4ee   : > { %v3453_v34 = vpop.eup %3452  ;;  %v2271_v51 = vadd.f32 %v3449_v60, %v2270_v28  ;;  %vm2292_vm12 = vcmp.eq.f32.partialorder %v2291_v46, 8.507059e+37 }
 0x4ef   : > { %2530 = vmatmul.bf16.gmra.mxu0 %v2406_v18  ;;  %2579 = vmatmul.bf16.gmra.mxu1 %v2406_v18  ;;  %v4737_v13 = vadd.f32 %v4524_v58, %v2057_v6  ;;  %v4740_v39 = vadd.f32 1.0, %v3453_v34  ;;  %v2278_v58 = vand.u32 2147483648, %v4705_v62  ;;  %v2294_v62 = vor.u32 1.1754944e-38, %v2293_v40 }
 0x4f0   : > { %v2275_v32 = vsel %vm2274_vm7, %v3449_v60, %v2271_v51 }
 0x4f1   : > { %v3030_v61 = vmul.f32 -1.442695, %v4737_v13  ;;  %v3455_v26 = vpop.eup %3454  ;;  %v2516_v43 = vpop.f32.mrf.mxu0  ;;  %v2279_v50 = vor.u32 1.1754944e-38, %v2278_v58  ;;  %vm2302_vm14 = vweird.f32 %v4740_v39 }
 0x4f2   : > { %v2565_v57 = vpop.f32.mrf.mxu1  ;;  %2605 = vst [vmem:[%s4742_s29] sm:$0xff] %v2516_v43  ;;  %v2283_v31 = vmul.f32 %v3455_v26, %v2140_v22  ;;  %vm2288_vm8 = vweird.f32 %v3455_v26 }
 0x4f3   : > { %3456 = vpow2.f32 %v3030_v61  ;;  %2606 = vst [vmem:[%s4742_s29 + $0x8] sm:$0xff] %v2565_v57  ;;  %v2280_v4 = vsel %vm2277_vm9, %v2279_v50, %v2275_v32  ;;  %vm2289_vm11 = vmor %vm2287_vm10, %vm2288_vm8  ;;  %v4773_v32 = vld [vmem:[%s4869_s5 + $0x1] ss:$0 sm:$0xff] }
 0x4f4   : > { %3458 = vrcp.f32 %v4740_v39  ;;  %v2284_v33 = vsub.f32 1.0, %v2283_v31  ;;  %v2395_v0 = vmul.f32 %v2280_v4, %v4695_v27  ;;  %v2308_v27 = vand.u32 2147483648, %v4740_v39 }
 0x4f6   : > { %v2285_v12 = vmul.f32 %v3455_v26, %v2284_v33  ;;  %v2309_v49 = vor.u32 1.1754944e-38, %v2308_v27 }
 0x4f8   : > { %v2286_v59 = vadd.f32 %v3455_v26, %v2285_v12 }
 0x4f9   : > { %v3457_v63 = vpop.eup %3456  ;;  %v2518_v17 = vpop.f32.mrf.mxu0 }
 0x4fa   : > { %v3459_v48 = vpop.eup %3458  ;;  %v2567_v5 = vpop.f32.mrf.mxu1  ;;  %v2142_v42 = vadd.f32 1.0, %v3457_v63  ;;  %2607 = vst [vmem:[%s4742_s29 + $0x10] sm:$0xff] %v2518_v17  ;;  %v2290_v11 = vsel %vm2289_vm11, %v3455_v26, %v2286_v59  ;;  %v4780_v63 = vld [vmem:[%s4870_s6 + $0x1] ss:$0 sm:$0xff] }
 0x4fb   : > { %v2298_v41 = vmul.f32 %v3459_v48, %v4740_v39  ;;  %2608 = vst [vmem:[%s4742_s29 + $0x18] sm:$0xff] %v2567_v5  ;;  %v2295_v53 = vsel %vm2292_vm12, %v2294_v62, %v2290_v11  ;;  %vm2303_vm13 = vweird.f32 %v3459_v48 }
 0x4fc   : > { %3460 = vrcp.f32 %v2142_v42  ;;  %v2396_v7 = vmul.f32 %v2295_v53, %v4703_v9  ;;  %v2306_v9 = vand.u32 2147483647, %v4740_v39  ;;  %vm2304_vm15 = vmor %vm2302_vm14, %vm2303_vm13  ;;  %v2323_v21 = vand.u32 2147483648, %v2142_v42 }
 0x4fd   : > { %v2299_v25 = vsub.f32 1.0, %v2298_v41  ;;  %3462 = vrsqrt.f32 %v1861_v54  ;;  %v2321_v20 = vand.u32 2147483647, %v2142_v42  ;;  %vm2317_vm2 = vweird.f32 %v2142_v42 }
 0x4fe   : > { %v2407_v14 = vpack.c.bf16 %v2396_v7, %v2395_v0  ;;  %vm2307_vm1 = vcmp.eq.f32.partialorder %v2306_v9, 8.507059e+37  ;;  %v2324_v55 = vor.u32 1.1754944e-38, %v2323_v21 }
 0x4ff   : > { %v2300_v37 = vmul.f32 %v3459_v48, %v2299_v25  ;;  %vm2322_vm4 = vcmp.eq.f32.partialorder %v2321_v20, 8.507059e+37 }
 0x500   : > { %2535 = vmatmul.bf16.gmra.mxu0 %v2407_v14  ;;  %2584 = vmatmul.bf16.gmra.mxu1 %v2407_v14 }
 0x501   : > { %v2521_v52 = vpop.f32.mrf.mxu0  ;;  %v2301_v56 = vadd.f32 %v3459_v48, %v2300_v37 }
 0x502   : > { %v3461_v2 = vpop.eup %3460  ;;  %v2570_v60 = vpop.f32.mrf.mxu1  ;;  %2609 = vst [vmem:[%s4742_s29 + $0x20] sm:$0xff] %v2521_v52 }
 0x503   : > { %v2313_v29 = vmul.f32 %v3461_v2, %v2142_v42  ;;  %2610 = vst [vmem:[%s4742_s29 + $0x28] sm:$0xff] %v2570_v60  ;;  %v2305_v19 = vsel %vm2304_vm15, %v3459_v48, %v2301_v56  ;;  %vm2318_vm0 = vweird.f32 %v3461_v2  ;;  %v3463_v18 = vpop.eup %3462 }
 0x504   : > { %v2310_v15 = vsel %vm2307_vm1, %v2309_v49, %v2305_v19  ;;  %vm2319_vm3 = vmor %vm2317_vm2, %vm2318_vm0  ;;  %v1986_v61 = vmul.f32 %v3463_v18, %v1861_v54  ;;  %vm1992_vm5 = vweird.f32 %v3463_v18 }
 0x505   : > { %v2314_v23 = vsub.f32 1.0, %v2313_v29  ;;  %v2397_v28 = vmul.f32 %v2310_v15, %v4727_v47  ;;  %vm1993_vm7 = vmor %vm1991_vm6, %vm1992_vm5 }
 0x506   : > { %v1987_v43 = vmul.f32 %v3463_v18, %v1986_v61 }
 0x507   : > { %v2315_v10 = vmul.f32 %v3461_v2, %v2314_v23 }
 0x508   : > { %v1988_v51 = vmul.f32 0.5, %v1987_v43 }
 0x509   : > { %v2316_v38 = vadd.f32 %v3461_v2, %v2315_v10  ;;  %v2523_v22 = vpop.f32.mrf.mxu0 }
 0x50a   : > { %v2572_v8 = vpop.f32.mrf.mxu1  ;;  %2611 = vst [vmem:[%s4742_s29 + $0x30] sm:$0xff] %v2523_v22  ;;  %v1989_v31 = vsub.f32 1.5, %v1988_v51 }
 0x50b   : > { %v2320_v30 = vsel %vm2319_vm3, %v3461_v2, %v2316_v38  ;;  %2612 = vst [vmem:[%s4742_s29 + $0x38] sm:$0xff] %v2572_v8 }
 0x50c   : > { %v2325_v6 = vsel %vm2322_vm4, %v2324_v55, %v2320_v30  ;;  %v1990_v33 = vmul.f32 %v3463_v18, %v1989_v31 }
 0x50d   : > { %v2398_v34 = vmul.f32 %v2325_v6, %v4737_v13 }
 0x50e   : > { %v1994_v47 = vsel %vm1993_vm7, %v3463_v18, %v1990_v33 }
 0x50f   : > { %v2408_v26 = vpack.c.bf16 %v2398_v34, %v2397_v28  ;;  %v2037_v13 = vmul.f32 %v1994_v47, %v4600_v3 }
 0x511   : > { %2540 = vmatmul.bf16.gmra.mxu0 %v2408_v26  ;;  %2589 = vmatmul.bf16.gmra.mxu1 %v2408_v26  ;;  %v2526_v57 = vpop.f32.mrf.mxu0  ;;  %v2058_v12 = vmul.f32 %v4773_v32, %v2037_v13 }
 0x512   : > { %v2575_v39 = vpop.f32.mrf.mxu1  ;;  %2613 = vst [vmem:[%s4742_s29 + $0x40] sm:$0xff] %v2526_v57 }
 0x513   : > { %2614 = vst [vmem:[%s4742_s29 + $0x48] sm:$0xff] %v2575_v39  ;;  %v4783_v59 = vadd.f32 %v4780_v63, %v2058_v12 }
 0x515   : > { %v3031_v48 = vmul.f32 -1.442695, %v4783_v59 }
 0x519   : > { %v2528_v58 = vpop.f32.mrf.mxu0 }
 0x51a   : > { %v2577_v1 = vpop.f32.mrf.mxu1  ;;  %2615 = vst [vmem:[%s4742_s29 + $0x50] sm:$0xff] %v2528_v58 }
 0x51b   : > { %2616 = vst [vmem:[%s4742_s29 + $0x58] sm:$0xff] %v2577_v1 }
 0x52b   : > { %v1828_v40 = vpop.xlane.xlu1 %1827 }
 0x52c   : > { %v1846_v46 = vmul.f32 %v1828_v40, %v4006_v45 }
 0x52e   : > { %v1862_v50 = vadd.f32 1e-05, %v1846_v46 }
 0x530   : > { %3464 = vrsqrt.f32 %v1862_v50  ;;  %vm2001_vm9 = vweird.f32 %v1862_v50 }
 0x531   : > { %3466 = vpow2.f32 %v3031_v48 }
 0x533   : > { %v1830_v3 = vpop.xlane.xlu2 %1829 }
 0x534   : > { %v1847_v17 = vmul.f32 %v1830_v3, %v4006_v45 }
 0x536   : > { %v3465_v5 = vpop.eup %3464  ;;  %v1863_v4 = vadd.f32 1e-05, %v1847_v17 }
 0x537   : > { %v1996_v62 = vmul.f32 %v3465_v5, %v1862_v50  ;;  %v3467_v53 = vpop.eup %3466  ;;  %vm2002_vm8 = vweird.f32 %v3465_v5 }
 0x538   : > { %3468 = vrsqrt.f32 %v1863_v4  ;;  %vm2003_vm10 = vmor %vm2001_vm9, %vm2002_vm8  ;;  %v2143_v54 = vadd.f32 1.0, %v3467_v53  ;;  %vm2011_vm12 = vweird.f32 %v1863_v4 }
 0x539   : > { %v1997_v42 = vmul.f32 %v3465_v5, %v1996_v62 }
 0x53a   : > { %v2338_v33 = vand.u32 2147483648, %v2143_v54  ;;  %vm2332_vm2 = vweird.f32 %v2143_v54 }
 0x53b   : > { %v1998_v36 = vmul.f32 0.5, %v1997_v42  ;;  %v1832_v11 = vpop.xlane.xlu0 %1831 }
 0x53c   : > { %v1848_v41 = vmul.f32 %v1832_v11, %v4006_v45  ;;  %v2339_v46 = vor.u32 1.1754944e-38, %v2338_v33 }
 0x53d   : > { %v1999_v0 = vsub.f32 1.5, %v1998_v36 }
 0x53e   : > { %v3469_v7 = vpop.eup %3468  ;;  %v1864_v25 = vadd.f32 1e-05, %v1848_v41 }
 0x53f   : > { %v2000_v24 = vmul.f32 %v3465_v5, %v1999_v0  ;;  %v2006_v14 = vmul.f32 %v3469_v7, %v1863_v4  ;;  %vm2012_vm11 = vweird.f32 %v3469_v7 }
 0x540   : > { %3470 = vrsqrt.f32 %v1864_v25  ;;  %vm2013_vm13 = vmor %vm2011_vm12, %vm2012_vm11  ;;  %vm2021_vm15 = vweird.f32 %v1864_v25 }
 0x541   : > { %v2004_v37 = vsel %vm2003_vm10, %v3465_v5, %v2000_v24  ;;  %v2007_v2 = vmul.f32 %v3469_v7, %v2006_v14  ;;  %3472 = vrcp.f32 %v2143_v54 }
 0x542   : > { %v2038_v52 = vmul.f32 %v2004_v37, %v4658_v16 }
 0x543   : > { %v2008_v60 = vmul.f32 0.5, %v2007_v2 }
 0x544   : > { %v2059_v56 = vmul.f32 %v4773_v32, %v2038_v52 }
 0x545   : > { %v2009_v29 = vsub.f32 1.5, %v2008_v60 }
 0x546   : > { %v3471_v45 = vpop.eup %3470  ;;  %v4791_v27 = vadd.f32 %v4780_v63, %v2059_v56 }
 0x547   : > { %v2010_v9 = vmul.f32 %v3469_v7, %v2009_v29  ;;  %v2016_v23 = vmul.f32 %v3471_v45, %v1864_v25  ;;  %v3473_v20 = vpop.eup %3472  ;;  %vm2022_vm14 = vweird.f32 %v3471_v45 }
 0x548   : > { %v3032_v21 = vmul.f32 -1.442695, %v4791_v27  ;;  %v2328_v55 = vmul.f32 %v3473_v20, %v2143_v54  ;;  %vm2023_vm0 = vmor %vm2021_vm15, %vm2022_vm14  ;;  %vm2333_vm1 = vweird.f32 %v3473_v20 }
 0x549   : > { %v2014_v19 = vsel %vm2013_vm13, %v3469_v7, %v2010_v9  ;;  %v2017_v10 = vmul.f32 %v3471_v45, %v2016_v23  ;;  %vm2334_vm3 = vmor %vm2332_vm2, %vm2333_vm1 }
 0x54a   : > { %3474 = vpow2.f32 %v3032_v21  ;;  %v2039_v16 = vmul.f32 %v2014_v19, %v4665_v35  ;;  %v2329_v34 = vsub.f32 1.0, %v2328_v55 }
 0x54b   : > { %v2018_v49 = vmul.f32 0.5, %v2017_v10 }
 0x54c   : > { %v2060_v38 = vmul.f32 %v4773_v32, %v2039_v16  ;;  %v2330_v26 = vmul.f32 %v3473_v20, %v2329_v34 }
 0x54d   : > { %v2019_v15 = vsub.f32 1.5, %v2018_v49 }
 0x54e   : > { %v4797_v22 = vadd.f32 %v4780_v63, %v2060_v38  ;;  %v2331_v58 = vadd.f32 %v3473_v20, %v2330_v26 }
 0x54f   : > { %v2020_v8 = vmul.f32 %v3471_v45, %v2019_v15 }
 0x550   : > { %v3475_v30 = vpop.eup %3474  ;;  %v3033_v18 = vmul.f32 -1.442695, %v4797_v22  ;;  %v2335_v40 = vsel %vm2334_vm3, %v3473_v20, %v2331_v58 }
 0x551   : > { %v2024_v6 = vsel %vm2023_vm0, %v3471_v45, %v2020_v8  ;;  %v2144_v28 = vadd.f32 1.0, %v3475_v30 }
 0x552   : > { %v2040_v35 = vmul.f32 %v2024_v6, %v4674_v44  ;;  %3476 = vpow2.f32 %v3033_v18  ;;  %v2336_v44 = vand.u32 2147483647, %v2143_v54 }
 0x553   : > { %3478 = vrcp.f32 %v2144_v28  ;;  %v2353_v13 = vand.u32 2147483648, %v2144_v28  ;;  %v2351_v12 = vand.u32 2147483647, %v2144_v28  ;;  %vm2347_vm6 = vweird.f32 %v2144_v28 }
 0x554   : > { %v2061_v61 = vmul.f32 %v4773_v32, %v2040_v35  ;;  %vm2337_vm5 = vcmp.eq.f32.partialorder %v2336_v44, 8.507059e+37 }
 0x555   : > { %v2340_v48 = vsel %vm2337_vm5, %v2339_v46, %v2335_v40  ;;  %v2354_v17 = vor.u32 1.1754944e-38, %v2353_v13  ;;  %vm2352_vm8 = vcmp.eq.f32.partialorder %v2351_v12, 8.507059e+37 }
 0x556   : > { %v4803_v43 = vadd.f32 %v4780_v63, %v2061_v61  ;;  %v2399_v36 = vmul.f32 %v2340_v48, %v4783_v59 }
 0x558   : > { %v3477_v57 = vpop.eup %3476  ;;  %v3034_v39 = vmul.f32 -1.442695, %v4803_v43 }
 0x559   : > { %v3479_v51 = vpop.eup %3478  ;;  %v2145_v31 = vadd.f32 1.0, %v3477_v57 }
 0x55a   : > { %v2343_v1 = vmul.f32 %v3479_v51, %v2144_v28  ;;  %3480 = vpow2.f32 %v3034_v39  ;;  %vm2348_vm4 = vweird.f32 %v3479_v51 }
 0x55b   : > { %3482 = vrcp.f32 %v2145_v31  ;;  %vm2349_vm7 = vmor %vm2347_vm6, %vm2348_vm4  ;;  %v2368_v14 = vand.u32 2147483648, %v2145_v31  ;;  %vm2362_vm10 = vweird.f32 %v2145_v31  ;;  %v2366_v54 = vand.u32 2147483647, %v2145_v31 }
 0x55c   : > { %v2344_v47 = vsub.f32 1.0, %v2343_v1 }
 0x55d   : > { %v2369_v45 = vor.u32 1.1754944e-38, %v2368_v14  ;;  %vm2367_vm13 = vcmp.eq.f32.partialorder %v2366_v54, 8.507059e+37 }
 0x55e   : > { %v2345_v32 = vmul.f32 %v3479_v51, %v2344_v47 }
 0x560   : > { %v3481_v50 = vpop.eup %3480  ;;  %v2346_v63 = vadd.f32 %v3479_v51, %v2345_v32 }
 0x561   : > { %v3483_v3 = vpop.eup %3482  ;;  %v2146_v5 = vadd.f32 1.0, %v3481_v50 }
 0x562   : > { %v2350_v4 = vsel %vm2349_vm7, %v3479_v51, %v2346_v63  ;;  %v2358_v62 = vmul.f32 %v3483_v3, %v2145_v31  ;;  %vm2363_vm9 = vweird.f32 %v3483_v3 }
 0x563   : > { %v2355_v42 = vsel %vm2352_vm8, %v2354_v17, %v2350_v4  ;;  %3484 = vrcp.f32 %v2146_v5  ;;  %vm2364_vm11 = vmor %vm2362_vm10, %vm2363_vm9  ;;  %v2383_v59 = vand.u32 2147483648, %v2146_v5  ;;  %v2381_v29 = vand.u32 2147483647, %v2146_v5 }
 0x564   : > { %v2400_v11 = vmul.f32 %v2355_v42, %v4791_v27  ;;  %v2359_v41 = vsub.f32 1.0, %v2358_v62  ;;  %vm2377_vm14 = vweird.f32 %v2146_v5 }
 0x565   : > { %v2384_v23 = vor.u32 1.1754944e-38, %v2383_v59  ;;  %vm2382_vm0 = vcmp.eq.f32.partialorder %v2381_v29, 8.507059e+37 }
 0x566   : > { %v2409_v53 = vpack.c.bf16 %v2400_v11, %v2399_v36  ;;  %v2360_v0 = vmul.f32 %v3483_v3, %v2359_v41 }
 0x568   : > { %2545 = vmatmul.bf16.gmra.mxu0 %v2409_v53  ;;  %2594 = vmatmul.bf16.gmra.mxu1 %v2409_v53  ;;  %v2361_v25 = vadd.f32 %v3483_v3, %v2360_v0 }
 0x569   : > { %v3485_v7 = vpop.eup %3484 }
 0x56a   : > { %v2373_v24 = vmul.f32 %v3485_v7, %v2146_v5  ;;  %v2365_v60 = vsel %vm2364_vm11, %v3483_v3, %v2361_v25  ;;  %vm2378_vm12 = vweird.f32 %v3485_v7 }
 0x56b   : > { %v2370_v9 = vsel %vm2367_vm13, %v2369_v45, %v2365_v60  ;;  %vm2379_vm15 = vmor %vm2377_vm14, %vm2378_vm12 }
 0x56c   : > { %v2531_v37 = vpop.f32.mrf.mxu0  ;;  %v2580_v2 = vpop.f32.mrf.mxu1  ;;  %v2374_v52 = vsub.f32 1.0, %v2373_v24  ;;  %v2401_v20 = vmul.f32 %v2370_v9, %v4797_v22 }
 0x56d   : > { %2617 = vst [vmem:[%s4742_s29 + $0x60] sm:$0xff] %v2531_v37 }
 0x56e   : > { %2618 = vst [vmem:[%s4742_s29 + $0x68] sm:$0xff] %v2580_v2  ;;  %v2375_v56 = vmul.f32 %v3485_v7, %v2374_v52 }
 0x570   : > { %v2376_v27 = vadd.f32 %v3485_v7, %v2375_v56 }
 0x572   : > { %v2380_v21 = vsel %vm2379_vm15, %v3485_v7, %v2376_v27 }
 0x573   : > { %v2385_v19 = vsel %vm2382_vm0, %v2384_v23, %v2380_v21 }
 0x574   : > { %v2533_v10 = vpop.f32.mrf.mxu0  ;;  %v2582_v16 = vpop.f32.mrf.mxu1  ;;  %v2402_v49 = vmul.f32 %v2385_v19, %v4803_v43 }
 0x575   : > { %2619 = vst [vmem:[%s4742_s29 + $0x70] sm:$0xff] %v2533_v10 }
 0x576   : > { %2620 = vst [vmem:[%s4742_s29 + $0x78] sm:$0xff] %v2582_v16  ;;  %v2410_v38 = vpack.c.bf16 %v2402_v49, %v2401_v20 }
 0x578   : > { %2550 = vmatmul.bf16.gmra.mxu0 %v2410_v38  ;;  %2599 = vmatmul.bf16.gmra.mxu1 %v2410_v38 }
 0x57d   : > { %v2536_v15 = vpop.f32.mrf.mxu0  ;;  %v2585_v55 = vpop.f32.mrf.mxu1 }
 0x57e   : > { %2621 = vst [vmem:[%s4742_s29 + $0x80] sm:$0xff] %v2536_v15 }
 0x57f   : > { %2622 = vst [vmem:[%s4742_s29 + $0x88] sm:$0xff] %v2585_v55 }
 0x585   : > { %v2538_v8 = vpop.f32.mrf.mxu0  ;;  %v2587_v30 = vpop.f32.mrf.mxu1 }
 0x586   : > { %2623 = vst [vmem:[%s4742_s29 + $0x90] sm:$0xff] %v2538_v8 }
 0x587   : > { %2624 = vst [vmem:[%s4742_s29 + $0x98] sm:$0xff] %v2587_v30 }
 0x58e   : > { %v2541_v22 = vpop.f32.mrf.mxu0  ;;  %v2590_v18 = vpop.f32.mrf.mxu1 }
 0x58f   : > { %2625 = vst [vmem:[%s4742_s29 + $0xa0] sm:$0xff] %v2541_v22 }
 0x590   : > { %2626 = vst [vmem:[%s4742_s29 + $0xa8] sm:$0xff] %v2590_v18 }
 0x596   : > { %v2543_v6 = vpop.f32.mrf.mxu0  ;;  %v2592_v28 = vpop.f32.mrf.mxu1 }
 0x597   : > { %2627 = vst [vmem:[%s4742_s29 + $0xb0] sm:$0xff] %v2543_v6 }
 0x598   : > { %2628 = vst [vmem:[%s4742_s29 + $0xb8] sm:$0xff] %v2592_v28 }
 0x5e5   : > { %v2546_v34 = vpop.f32.mrf.mxu0  ;;  %v2595_v35 = vpop.f32.mrf.mxu1 }
 0x5e6   : > { %2629 = vst [vmem:[%s4742_s29 + $0xc0] sm:$0xff] %v2546_v34 }
 0x5e7   : > { %2630 = vst [vmem:[%s4742_s29 + $0xc8] sm:$0xff] %v2595_v35 }
 0x5ed   : > { %v2548_v61 = vpop.f32.mrf.mxu0  ;;  %v2597_v26 = vpop.f32.mrf.mxu1 }
 0x5ee   : > { %2631 = vst [vmem:[%s4742_s29 + $0xd0] sm:$0xff] %v2548_v61 }
 0x5ef   : > { %2632 = vst [vmem:[%s4742_s29 + $0xd8] sm:$0xff] %v2597_v26 }
 0x5f5   : > { %v2551_v43 = vpop.f32.mrf.mxu0  ;;  %v2600_v57 = vpop.f32.mrf.mxu1 }
 0x5f6   : > { %2633 = vst [vmem:[%s4742_s29 + $0xe0] sm:$0xff] %v2551_v43 }
 0x5f7   : > { %2634 = vst [vmem:[%s4742_s29 + $0xe8] sm:$0xff] %v2600_v57 }
 0x5fd   : > { %v2553_v39 = vpop.f32.mrf.mxu0  ;;  %v2602_v51 = vpop.f32.mrf.mxu1 }
 0x5fe   : > { %2635 = vst [vmem:[%s4742_s29 + $0xf0] sm:$0xff] %v2553_v39 }
 0x5ff   : > { %2636 = vst [vmem:[%s4742_s29 + $0xf8] sm:$0xff] %v2602_v51 }
 0x600   : > { %3697 = shalt.err (!%p3694_p11)
}
 0x601   : > { %s3763_s19 = smov 256   ;;  %s3764_s7 = smov 16  }
 0x602   : > { %3209 = dma.vmem_to_hbm [thread:$0]  (%p3906_p5), %s2652_s21, 4096, %s2654_s15, %s2638_s25, %s3763_s19, %s3763_s19, %s3764_s7  }
 0x603 PF: > { %s2668_s29 = sand.u32 1, %s3740_s27   ;;  %p4916_p12 = scmp.ge.s32.totalorder %s3752_s30, 2 }
 0x604   : > { %s2669_s0 = scalar_lea.sflag [#allocation4], %s2668_s29 }
 0x605   : > { %p3232_p13 = pnand %p4916_p12, %p3845_p6 }
 0x607   : > { %p3233_p0 = pneg %p3232_p13 }
 0x609   : > { %3735 = dma.done.wait (%p3233_p0), %s2669_s0, 4096  }
 0x60a   : > { %3737 = vsyncadd (%p3233_p0), %s2669_s0, 4294963200  ;;  %s4917_s17 = sld [smem:[#allocation20_spill]]  ;;  %p26_p3 = scmp.ge.s32.totalorder %s3893_s13, 4  }
 0x60b   : > { %s4918_s29 = sld [smem:[#allocation21_spill]]  ;;  %s4919_s27 = smov %s3744_s28 }
 0x60c   : > { %s4921_s30 = smov %s3893_s13  ;;  %28 = sbr.rel (!%p26_p3) target bundleno = 15 (0xf), region = 129 }
 0x610   : > { %s4920_s28 = smov %s4917_s17 }
 0x611   :  { %2675 = vsyncpa [#allocation3], 1 }
 0x612   :  { %2677 = vsyncpa [#allocation3 + $0x1], 1 }
 0x613   :  { %2678 = vsyncpa [#allocation6], 1 }
 0x614   :  { %2680 = vsyncpa [#allocation6 + $0x1], 1 }
 0x615   :  { %2681 = vsyncpa [#allocation9], 1 }
 0x616   :  { %2682 = vsyncpa [#allocation12], 1 }
 0x617   :  { %2683 = vsyncpa [#allocation4], 1 }
 0x618   :  { %2685 = vsyncpa [#allocation4 + $0x1], 1 }

</bundles_post_ra>
